<compile_context>
chip_gen: v7x
topology: tpu7x:2x2x1
jax: 0.10.0
libtpu: 0.0.40
codegen_flags: <defaults>
</compile_context>

<pallas_src>
import functools

import jax
import jax.numpy as jnp
from jax.experimental import pallas as pl
from jax.experimental.pallas import tpu as pltpu


def _silu(x):
    return x * jax.nn.sigmoid(x)


def _round_up(n, m):
    return ((n + m - 1) // m) * m


def vae_loss_kernel(
    x_ref, e_ref,
    ew1_ref, eb1_ref, ew2_ref, eb2_ref,
    ewm_ref, ebm_ref, ews_ref, ebs_ref,
    dw1_ref, db1_ref, dw2_ref, db2_ref, dw3_ref, db3_ref,
    out_ref,
    *, x_dim, z_dim, batch, tile_b,
):
    bf16, f32 = jnp.bfloat16, jnp.float32
    x = x_ref[...]                                    # (TILE_B, XP) f32
    e = e_ref[...]                                    # (TILE_B, ZP) f32

    # ---- encoder: Linear -> SiLU -> Linear -> SiLU -> (mean head | log-std head)
    h = _silu(jnp.dot(x.astype(bf16), ew1_ref[...], preferred_element_type=f32)
              + eb1_ref[...])
    h = _silu(jnp.dot(h.astype(bf16), ew2_ref[...], preferred_element_type=f32)
              + eb2_ref[...])
    h_bf = h.astype(bf16)
    mean_qz = jnp.dot(h_bf, ewm_ref[...], preferred_element_type=f32) + ebm_ref[...]
    log_std_qz = jnp.dot(h_bf, ews_ref[...], preferred_element_type=f32) + ebs_ref[...]
    std_qz = jnp.exp(log_std_qz)

    # Reparameterization. Padded z lanes: mean=0, log_std=0 -> std=1, e=0 -> z=0.
    z = mean_qz + e * std_qz

    # ---- decoder: Linear -> SiLU -> Linear -> SiLU -> Linear -> Sigmoid
    g = _silu(jnp.dot(z.astype(bf16), dw1_ref[...], preferred_element_type=f32)
              + db1_ref[...])
    g = _silu(jnp.dot(g.astype(bf16), dw2_ref[...], preferred_element_type=f32)
              + db2_ref[...])
    mean_px = jax.nn.sigmoid(
        jnp.dot(g.astype(bf16), dw3_ref[...], preferred_element_type=f32)
        + db3_ref[...])

    # ---- per-example ELBO ----
    # Reconstruction: padded x lanes would add (0 - sigmoid(0))^2, so mask them.
    lane = jax.lax.broadcasted_iota(jnp.int32, x.shape, dimension=1)
    diff = jnp.where(lane < x_dim, x - mean_px, 0.0)
    log_px_given_z = -0.5 * jnp.sum(diff * diff, axis=-1, keepdims=True)  # (TILE_B,1)

    # Fused KL lane-reduction. Padded z lanes give mean^2 + std^2 - 1 - 2*log_std == 0;
    # add z_dim back for the "-1" subtracted on the valid lanes (PyTorch KL has no -1).
    kl_terms = mean_qz * mean_qz + std_qz * std_qz - 1.0 - 2.0 * log_std_qz
    kl = 0.5 * (jnp.sum(kl_terms, axis=-1, keepdims=True) + float(z_dim))  # (TILE_B,1)

    elbo = log_px_given_z - kl                                             # (TILE_B,1)

    # Mask padded batch rows and reduce to a per-tile partial ELBO sum; write it
    # as a single full (8, 128) unmasked vreg store (lane/sublane-dense).
    row0 = pl.program_id(0) * tile_b
    row = row0 + jax.lax.broadcasted_iota(jnp.int32, elbo.shape, dimension=0)
    tile_sum = jnp.sum(jnp.where(row < batch, elbo, 0.0))
    out_ref[...] = tile_sum * jnp.ones(out_ref.shape, f32)


def _pad2d(a, rows, cols, dtype):
    a = a.astype(dtype)
    pr, pc = rows - a.shape[0], cols - a.shape[1]
    if pr or pc:
        a = jnp.pad(a, ((0, pr), (0, pc)))
    return a


def vae_forward_pallas(x, e, params, *, tile_b=128):
    """Scalar negative ELBO (mean over batch), matching VAE.forward."""
    (ew1, eb1, ew2, eb2, ew3, eb3, dw1, db1, dw2, db2, dw3, db3) = params
    B, x_dim = x.shape
    z_dim = e.shape[1]
    dim = ew1.shape[1]

    XP = _round_up(x_dim, 128)
    DP = _round_up(dim, 128)
    ZP = _round_up(z_dim, 128)
    BP = _round_up(B, tile_b)
    num_tiles = BP // tile_b

    # Split the encoder head (avoids a lane-offset z_dim slice inside the kernel).
    ewm, ews = ew3[:, :z_dim], ew3[:, z_dim:]
    ebm, ebs = eb3[:, :z_dim], eb3[:, z_dim:]

    bf16, f32 = jnp.bfloat16, jnp.float32
    x_p = _pad2d(x, BP, XP, f32)
    e_p = _pad2d(e, BP, ZP, f32)
    weights = (
        _pad2d(ew1, XP, DP, bf16), _pad2d(eb1, 1, DP, f32),
        _pad2d(ew2, DP, DP, bf16), _pad2d(eb2, 1, DP, f32),
        _pad2d(ewm, DP, ZP, bf16), _pad2d(ebm, 1, ZP, f32),
        _pad2d(ews, DP, ZP, bf16), _pad2d(ebs, 1, ZP, f32),
        _pad2d(dw1, ZP, DP, bf16), _pad2d(db1, 1, DP, f32),
        _pad2d(dw2, DP, DP, bf16), _pad2d(db2, 1, DP, f32),
        _pad2d(dw3, DP, XP, bf16), _pad2d(db3, 1, XP, f32),
    )

    def resident(a):
        # Constant index_map: the tile is fetched once and stays VMEM-resident.
        return pl.BlockSpec(a.shape, lambda i: (0, 0))

    in_specs = [
        pl.BlockSpec((tile_b, XP), lambda i: (i, 0)),   # x batch tile
        pl.BlockSpec((tile_b, ZP), lambda i: (i, 0)),   # e batch tile
    ] + [resident(w) for w in weights]

    flops = 2 * BP * (XP * DP + DP * DP + 2 * DP * ZP + ZP * DP + DP * DP + DP * XP)
    transcendentals = BP * (4 * DP + ZP + XP)
    bytes_accessed = (
        x_p.size * x_p.dtype.itemsize + e_p.size * e_p.dtype.itemsize
        + sum(int(w.size) * w.dtype.itemsize for w in weights)
        + num_tiles * 8 * 128 * 4)

    out = pl.pallas_call(
        functools.partial(vae_loss_kernel, x_dim=x_dim, z_dim=z_dim,
                          batch=B, tile_b=tile_b),
        out_shape=jax.ShapeDtypeStruct((num_tiles, 8, 128), f32),
        grid=(num_tiles,),
        in_specs=in_specs,
        out_specs=pl.BlockSpec((1, 8, 128), lambda i: (i, 0, 0)),
        compiler_params=pltpu.CompilerParams(
            dimension_semantics=("parallel",)),
        cost_estimate=pl.CostEstimate(
            flops=flops, transcendentals=transcendentals,
            bytes_accessed=bytes_accessed),
    )(x_p, e_p, *weights)

    # Per-tile partial ELBO sums -> mean over valid batch rows.
    elbo_sum = jnp.sum(out[:, 0, 0])
    return -(elbo_sum / B)


def init_linear(key, fan_in, fan_out):
    """PyTorch-style uniform(-1/sqrt(fan_in), 1/sqrt(fan_in)); stored as (in, out)."""
    kw, kb = jax.random.split(key)
    bound = 1.0 / jnp.sqrt(fan_in)
    w = jax.random.uniform(kw, (fan_in, fan_out), jnp.float32, -bound, bound)
    b = jax.random.uniform(kb, (1, fan_out), jnp.float32, -bound, bound)
    return w, b


def init_vae_params(key, x_dim, z_dim, dim):
    keys = jax.random.split(key, 6)
    ew1, eb1 = init_linear(keys[0], x_dim, dim)
    ew2, eb2 = init_linear(keys[1], dim, dim)
    ew3, eb3 = init_linear(keys[2], dim, 2 * z_dim)
    dw1, db1 = init_linear(keys[3], z_dim, dim)
    dw2, db2 = init_linear(keys[4], dim, dim)
    dw3, db3 = init_linear(keys[5], dim, x_dim)
    return (ew1, eb1, ew2, eb2, ew3, eb3, dw1, db1, dw2, db2, dw3, db3)


def vae_forward_ref(x, e, params):
    """Pure-JAX reference (same bf16-matmul / f32-accumulate recipe as the kernel)."""
    (ew1, eb1, ew2, eb2, ew3, eb3, dw1, db1, dw2, db2, dw3, db3) = params

    def mm(a, w):
        return jnp.dot(a.astype(jnp.bfloat16), w.astype(jnp.bfloat16),
                       preferred_element_type=jnp.float32)

    h = _silu(mm(x, ew1) + eb1)
    h = _silu(mm(h, ew2) + eb2)
    enc = mm(h, ew3) + eb3
    z_dim = e.shape[-1]
    mean_qz, log_std_qz = enc[:, :z_dim], enc[:, z_dim:]
    std_qz = jnp.exp(log_std_qz)
    z = mean_qz + e * std_qz
    g = _silu(mm(z, dw1) + db1)
    g = _silu(mm(g, dw2) + db2)
    mean_px = jax.nn.sigmoid(mm(g, dw3) + db3)
    log_px = -0.5 * jnp.sum((x - mean_px) ** 2, axis=-1)
    kl = 0.5 * (jnp.sum(mean_qz ** 2, -1) + jnp.sum(std_qz ** 2, -1)
                - 2.0 * jnp.sum(log_std_qz, -1))
    return -jnp.mean(log_px - kl)


if __name__ == "__main__":
    # Small shapes consistent with the module's MLP forward.
    B, X_DIM, Z_DIM, DIM = 8, 64, 8, 32

    key = jax.random.PRNGKey(0)
    k_params, k_x, k_e = jax.random.split(key, 3)

    params = init_vae_params(k_params, X_DIM, Z_DIM, DIM)
    x = jax.random.uniform(k_x, (B, X_DIM), jnp.float32)    # MNIST-like in [0,1]
    e = jax.random.normal(k_e, (B, Z_DIM), jnp.float32)     # reparam noise

    loss = jax.jit(vae_forward_pallas)(x, e, params)
    loss = jax.block_until_ready(loss)

    ref = vae_forward_ref(x, e, params)
    assert jnp.allclose(loss, ref, atol=1e-2, rtol=1e-2), (loss, ref)

    print("KERNEL_OK")
</pallas_src>

<mosaic_0001>
module attributes {stable_mosaic.version = 11 : i64} {
  func.func @vae_loss_kernel(%arg0: i32, %arg1: memref<128x128xf32, #tpu.memory_space<vmem>>, %arg2: memref<128x128xf32, #tpu.memory_space<vmem>>, %arg3: memref<128x128xbf16, #tpu.memory_space<vmem>>, %arg4: memref<1x128xf32, #tpu.memory_space<vmem>>, %arg5: memref<128x128xbf16, #tpu.memory_space<vmem>>, %arg6: memref<1x128xf32, #tpu.memory_space<vmem>>, %arg7: memref<128x128xbf16, #tpu.memory_space<vmem>>, %arg8: memref<1x128xf32, #tpu.memory_space<vmem>>, %arg9: memref<128x128xbf16, #tpu.memory_space<vmem>>, %arg10: memref<1x128xf32, #tpu.memory_space<vmem>>, %arg11: memref<128x128xbf16, #tpu.memory_space<vmem>>, %arg12: memref<1x128xf32, #tpu.memory_space<vmem>>, %arg13: memref<128x128xbf16, #tpu.memory_space<vmem>>, %arg14: memref<1x128xf32, #tpu.memory_space<vmem>>, %arg15: memref<128x128xbf16, #tpu.memory_space<vmem>>, %arg16: memref<1x128xf32, #tpu.memory_space<vmem>>, %arg17: memref<1x8x128xf32, #tpu.memory_space<vmem>>) attributes {dimension_semantics = [#tpu.dimension_semantics<parallel>], iteration_bounds = array<i64: 1>, scalar_prefetch = 0 : i64, scratch_operands = 0 : i64, tpu.core_type = #tpu.core_type<tc>, window_params = [{transform_indices = @transform_0, window_bounds = array<i64: 128, 128>}, {transform_indices = @transform_1, window_bounds = array<i64: 128, 128>}, {pipeline_mode = #tpu.pipeline_mode<synchronous>, transform_indices = @transform_2, window_bounds = array<i64: 128, 128>}, {pipeline_mode = #tpu.pipeline_mode<synchronous>, transform_indices = @transform_3, window_bounds = array<i64: 1, 128>}, {pipeline_mode = #tpu.pipeline_mode<synchronous>, transform_indices = @transform_4, window_bounds = array<i64: 128, 128>}, {pipeline_mode = #tpu.pipeline_mode<synchronous>, transform_indices = @transform_5, window_bounds = array<i64: 1, 128>}, {pipeline_mode = #tpu.pipeline_mode<synchronous>, transform_indices = @transform_6, window_bounds = array<i64: 128, 128>}, {pipeline_mode = #tpu.pipeline_mode<synchronous>, transform_indices = @transform_7, window_bounds = array<i64: 1, 128>}, {pipeline_mode = #tpu.pipeline_mode<synchronous>, transform_indices = @transform_8, window_bounds = array<i64: 128, 128>}, {pipeline_mode = #tpu.pipeline_mode<synchronous>, transform_indices = @transform_9, window_bounds = array<i64: 1, 128>}, {pipeline_mode = #tpu.pipeline_mode<synchronous>, transform_indices = @transform_10, window_bounds = array<i64: 128, 128>}, {pipeline_mode = #tpu.pipeline_mode<synchronous>, transform_indices = @transform_11, window_bounds = array<i64: 1, 128>}, {pipeline_mode = #tpu.pipeline_mode<synchronous>, transform_indices = @transform_12, window_bounds = array<i64: 128, 128>}, {pipeline_mode = #tpu.pipeline_mode<synchronous>, transform_indices = @transform_13, window_bounds = array<i64: 1, 128>}, {pipeline_mode = #tpu.pipeline_mode<synchronous>, transform_indices = @transform_14, window_bounds = array<i64: 128, 128>}, {pipeline_mode = #tpu.pipeline_mode<synchronous>, transform_indices = @transform_15, window_bounds = array<i64: 1, 128>}, {transform_indices = @transform_16, window_bounds = array<i64: 1, 8, 128>}]} {
    %c0 = arith.constant 0 : index
    %c0_0 = arith.constant 0 : index
    %0 = vector.load %arg1[%c0, %c0_0] : memref<128x128xf32, #tpu.memory_space<vmem>>, vector<128x128xf32>
    %c0_1 = arith.constant 0 : index
    %c0_2 = arith.constant 0 : index
    %1 = vector.load %arg2[%c0_1, %c0_2] : memref<128x128xf32, #tpu.memory_space<vmem>>, vector<128x128xf32>
    %2 = arith.truncf %0 : vector<128x128xf32> to vector<128x128xbf16>
    %c0_3 = arith.constant 0 : index
    %c0_4 = arith.constant 0 : index
    %3 = vector.load %arg3[%c0_3, %c0_4] : memref<128x128xbf16, #tpu.memory_space<vmem>>, vector<128x128xbf16>
    %cst = arith.constant dense<0.000000e+00> : vector<128x128xf32>
    %4 = tpu.matmul %2, %3, %cst {dimension_numbers = #tpu.dot_dimension_numbers<[1], [0], [0], [1], [0, 0, 1, 1], [], []>} : vector<128x128xbf16>, vector<128x128xbf16>, vector<128x128xf32> -> vector<128x128xf32>
    %c0_5 = arith.constant 0 : index
    %c0_6 = arith.constant 0 : index
    %5 = vector.load %arg4[%c0_5, %c0_6] : memref<1x128xf32, #tpu.memory_space<vmem>>, vector<1x128xf32>
    %6 = vector.broadcast %5 : vector<1x128xf32> to vector<128x128xf32>
    %7 = arith.addf %4, %6 : vector<128x128xf32>
    %8 = arith.negf %7 : vector<128x128xf32>
    %9 = math.exp %8 : vector<128x128xf32>
    %cst_7 = arith.constant 1.000000e+00 : f32
    %10 = vector.broadcast %cst_7 : f32 to vector<128x128xf32>
    %11 = arith.addf %10, %9 : vector<128x128xf32>
    %12 = arith.divf %10, %11 : vector<128x128xf32>
    %13 = arith.mulf %7, %12 : vector<128x128xf32>
    %14 = arith.truncf %13 : vector<128x128xf32> to vector<128x128xbf16>
    %c0_8 = arith.constant 0 : index
    %c0_9 = arith.constant 0 : index
    %15 = vector.load %arg5[%c0_8, %c0_9] : memref<128x128xbf16, #tpu.memory_space<vmem>>, vector<128x128xbf16>
    %cst_10 = arith.constant dense<0.000000e+00> : vector<128x128xf32>
    %16 = tpu.matmul %14, %15, %cst_10 {dimension_numbers = #tpu.dot_dimension_numbers<[1], [0], [0], [1], [0, 0, 1, 1], [], []>} : vector<128x128xbf16>, vector<128x128xbf16>, vector<128x128xf32> -> vector<128x128xf32>
    %c0_11 = arith.constant 0 : index
    %c0_12 = arith.constant 0 : index
    %17 = vector.load %arg6[%c0_11, %c0_12] : memref<1x128xf32, #tpu.memory_space<vmem>>, vector<1x128xf32>
    %18 = vector.broadcast %17 : vector<1x128xf32> to vector<128x128xf32>
    %19 = arith.addf %16, %18 : vector<128x128xf32>
    %20 = arith.negf %19 : vector<128x128xf32>
    %21 = math.exp %20 : vector<128x128xf32>
    %cst_13 = arith.constant 1.000000e+00 : f32
    %22 = vector.broadcast %cst_13 : f32 to vector<128x128xf32>
    %23 = arith.addf %22, %21 : vector<128x128xf32>
    %24 = arith.divf %22, %23 : vector<128x128xf32>
    %25 = arith.mulf %19, %24 : vector<128x128xf32>
    %26 = arith.truncf %25 : vector<128x128xf32> to vector<128x128xbf16>
    %c0_14 = arith.constant 0 : index
    %c0_15 = arith.constant 0 : index
    %27 = vector.load %arg7[%c0_14, %c0_15] : memref<128x128xbf16, #tpu.memory_space<vmem>>, vector<128x128xbf16>
    %cst_16 = arith.constant dense<0.000000e+00> : vector<128x128xf32>
    %28 = tpu.matmul %26, %27, %cst_16 {dimension_numbers = #tpu.dot_dimension_numbers<[1], [0], [0], [1], [0, 0, 1, 1], [], []>} : vector<128x128xbf16>, vector<128x128xbf16>, vector<128x128xf32> -> vector<128x128xf32>
    %c0_17 = arith.constant 0 : index
    %c0_18 = arith.constant 0 : index
    %29 = vector.load %arg8[%c0_17, %c0_18] : memref<1x128xf32, #tpu.memory_space<vmem>>, vector<1x128xf32>
    %30 = vector.broadcast %29 : vector<1x128xf32> to vector<128x128xf32>
    %31 = arith.addf %28, %30 : vector<128x128xf32>
    %c0_19 = arith.constant 0 : index
    %c0_20 = arith.constant 0 : index
    %32 = vector.load %arg9[%c0_19, %c0_20] : memref<128x128xbf16, #tpu.memory_space<vmem>>, vector<128x128xbf16>
    %cst_21 = arith.constant dense<0.000000e+00> : vector<128x128xf32>
    %33 = tpu.matmul %26, %32, %cst_21 {dimension_numbers = #tpu.dot_dimension_numbers<[1], [0], [0], [1], [0, 0, 1, 1], [], []>} : vector<128x128xbf16>, vector<128x128xbf16>, vector<128x128xf32> -> vector<128x128xf32>
    %c0_22 = arith.constant 0 : index
    %c0_23 = arith.constant 0 : index
    %34 = vector.load %arg10[%c0_22, %c0_23] : memref<1x128xf32, #tpu.memory_space<vmem>>, vector<1x128xf32>
    %35 = vector.broadcast %34 : vector<1x128xf32> to vector<128x128xf32>
    %36 = arith.addf %33, %35 : vector<128x128xf32>
    %37 = math.exp %36 : vector<128x128xf32>
    %38 = arith.mulf %1, %37 : vector<128x128xf32>
    %39 = arith.addf %31, %38 : vector<128x128xf32>
    %40 = arith.truncf %39 : vector<128x128xf32> to vector<128x128xbf16>
    %c0_24 = arith.constant 0 : index
    %c0_25 = arith.constant 0 : index
    %41 = vector.load %arg11[%c0_24, %c0_25] : memref<128x128xbf16, #tpu.memory_space<vmem>>, vector<128x128xbf16>
    %cst_26 = arith.constant dense<0.000000e+00> : vector<128x128xf32>
    %42 = tpu.matmul %40, %41, %cst_26 {dimension_numbers = #tpu.dot_dimension_numbers<[1], [0], [0], [1], [0, 0, 1, 1], [], []>} : vector<128x128xbf16>, vector<128x128xbf16>, vector<128x128xf32> -> vector<128x128xf32>
    %c0_27 = arith.constant 0 : index
    %c0_28 = arith.constant 0 : index
    %43 = vector.load %arg12[%c0_27, %c0_28] : memref<1x128xf32, #tpu.memory_space<vmem>>, vector<1x128xf32>
    %44 = vector.broadcast %43 : vector<1x128xf32> to vector<128x128xf32>
    %45 = arith.addf %42, %44 : vector<128x128xf32>
    %46 = arith.negf %45 : vector<128x128xf32>
    %47 = math.exp %46 : vector<128x128xf32>
    %cst_29 = arith.constant 1.000000e+00 : f32
    %48 = vector.broadcast %cst_29 : f32 to vector<128x128xf32>
    %49 = arith.addf %48, %47 : vector<128x128xf32>
    %50 = arith.divf %48, %49 : vector<128x128xf32>
    %51 = arith.mulf %45, %50 : vector<128x128xf32>
    %52 = arith.truncf %51 : vector<128x128xf32> to vector<128x128xbf16>
    %c0_30 = arith.constant 0 : index
    %c0_31 = arith.constant 0 : index
    %53 = vector.load %arg13[%c0_30, %c0_31] : memref<128x128xbf16, #tpu.memory_space<vmem>>, vector<128x128xbf16>
    %cst_32 = arith.constant dense<0.000000e+00> : vector<128x128xf32>
    %54 = tpu.matmul %52, %53, %cst_32 {dimension_numbers = #tpu.dot_dimension_numbers<[1], [0], [0], [1], [0, 0, 1, 1], [], []>} : vector<128x128xbf16>, vector<128x128xbf16>, vector<128x128xf32> -> vector<128x128xf32>
    %c0_33 = arith.constant 0 : index
    %c0_34 = arith.constant 0 : index
    %55 = vector.load %arg14[%c0_33, %c0_34] : memref<1x128xf32, #tpu.memory_space<vmem>>, vector<1x128xf32>
    %56 = vector.broadcast %55 : vector<1x128xf32> to vector<128x128xf32>
    %57 = arith.addf %54, %56 : vector<128x128xf32>
    %58 = arith.negf %57 : vector<128x128xf32>
    %59 = math.exp %58 : vector<128x128xf32>
    %cst_35 = arith.constant 1.000000e+00 : f32
    %60 = vector.broadcast %cst_35 : f32 to vector<128x128xf32>
    %61 = arith.addf %60, %59 : vector<128x128xf32>
    %62 = arith.divf %60, %61 : vector<128x128xf32>
    %63 = arith.mulf %57, %62 : vector<128x128xf32>
    %64 = arith.truncf %63 : vector<128x128xf32> to vector<128x128xbf16>
    %c0_36 = arith.constant 0 : index
    %c0_37 = arith.constant 0 : index
    %65 = vector.load %arg15[%c0_36, %c0_37] : memref<128x128xbf16, #tpu.memory_space<vmem>>, vector<128x128xbf16>
    %cst_38 = arith.constant dense<0.000000e+00> : vector<128x128xf32>
    %66 = tpu.matmul %64, %65, %cst_38 {dimension_numbers = #tpu.dot_dimension_numbers<[1], [0], [0], [1], [0, 0, 1, 1], [], []>} : vector<128x128xbf16>, vector<128x128xbf16>, vector<128x128xf32> -> vector<128x128xf32>
    %c0_39 = arith.constant 0 : index
    %c0_40 = arith.constant 0 : index
    %67 = vector.load %arg16[%c0_39, %c0_40] : memref<1x128xf32, #tpu.memory_space<vmem>>, vector<1x128xf32>
    %68 = vector.broadcast %67 : vector<1x128xf32> to vector<128x128xf32>
    %69 = arith.addf %66, %68 : vector<128x128xf32>
    %70 = arith.negf %69 : vector<128x128xf32>
    %71 = math.exp %70 : vector<128x128xf32>
    %cst_41 = arith.constant 1.000000e+00 : f32
    %72 = vector.broadcast %cst_41 : f32 to vector<128x128xf32>
    %73 = arith.addf %72, %71 : vector<128x128xf32>
    %74 = arith.divf %72, %73 : vector<128x128xf32>
    %75 = tpu.iota {dimensions = array<i32: 1>} : vector<128x128xi32>
    %c64_i32 = arith.constant 64 : i32
    %76 = vector.broadcast %c64_i32 : i32 to vector<128x128xi32>
    %77 = arith.cmpi slt, %75, %76 : vector<128x128xi32>
    %78 = arith.subf %0, %74 : vector<128x128xf32>
    %cst_42 = arith.constant 0.000000e+00 : f32
    %79 = vector.broadcast %cst_42 : f32 to vector<128x128xf32>
    %80 = arith.select %77, %78, %79 : vector<128x128xi1>, vector<128x128xf32>
    %81 = arith.mulf %80, %80 : vector<128x128xf32>
    %cst_43 = arith.constant dense<0.000000e+00> : vector<128xf32>
    %82 = vector.multi_reduction <add>, %81, %cst_43 [1] : vector<128x128xf32> to vector<128xf32>
    %83 = vector.shape_cast %82 : vector<128xf32> to vector<128x1xf32>
    %cst_44 = arith.constant -5.000000e-01 : f32
    %84 = vector.broadcast %cst_44 : f32 to vector<128x1xf32>
    %85 = arith.mulf %84, %83 : vector<128x1xf32>
    %86 = arith.mulf %31, %31 : vector<128x128xf32>
    %87 = arith.mulf %37, %37 : vector<128x128xf32>
    %88 = arith.addf %86, %87 : vector<128x128xf32>
    %cst_45 = arith.constant 1.000000e+00 : f32
    %89 = vector.broadcast %cst_45 : f32 to vector<128x128xf32>
    %90 = arith.subf %88, %89 : vector<128x128xf32>
    %cst_46 = arith.constant 2.000000e+00 : f32
    %91 = vector.broadcast %cst_46 : f32 to vector<128x128xf32>
    %92 = arith.mulf %91, %36 : vector<128x128xf32>
    %93 = arith.subf %90, %92 : vector<128x128xf32>
    %cst_47 = arith.constant dense<0.000000e+00> : vector<128xf32>
    %94 = vector.multi_reduction <add>, %93, %cst_47 [1] : vector<128x128xf32> to vector<128xf32>
    %95 = vector.shape_cast %94 : vector<128xf32> to vector<128x1xf32>
    %cst_48 = arith.constant 8.000000e+00 : f32
    %96 = vector.broadcast %cst_48 : f32 to vector<128x1xf32>
    %97 = arith.addf %95, %96 : vector<128x1xf32>
    %cst_49 = arith.constant 5.000000e-01 : f32
    %98 = vector.broadcast %cst_49 : f32 to vector<128x1xf32>
    %99 = arith.mulf %98, %97 : vector<128x1xf32>
    %100 = arith.subf %85, %99 : vector<128x1xf32>
    %c128_i32 = arith.constant 128 : i32
    %101 = arith.muli %arg0, %c128_i32 : i32
    %102 = tpu.iota {dimensions = array<i32: 0>} : vector<128x1xi32>
    %103 = vector.broadcast %101 : i32 to vector<128x1xi32>
    %104 = arith.addi %103, %102 : vector<128x1xi32>
    %c8_i32 = arith.constant 8 : i32
    %105 = vector.broadcast %c8_i32 : i32 to vector<128x1xi32>
    %106 = arith.cmpi slt, %104, %105 : vector<128x1xi32>
    %cst_50 = arith.constant 0.000000e+00 : f32
    %107 = vector.broadcast %cst_50 : f32 to vector<128x1xf32>
    %108 = arith.select %106, %100, %107 : vector<128x1xi1>, vector<128x1xf32>
    %109 = vector.shape_cast %108 : vector<128x1xf32> to vector<1x128x1xf32>
    %cst_51 = arith.constant dense<0.000000e+00> : vector<1xf32>
    %110 = vector.multi_reduction <add>, %109, %cst_51 [1, 2] : vector<1x128x1xf32> to vector<1xf32>
    %111 = vector.shape_cast %110 : vector<1xf32> to vector<1x1x1xf32>
    %112 = vector.extract %111[0, 0, 0] : f32 from vector<1x1x1xf32>
    %cst_52 = arith.constant 1.000000e+00 : f32
    %113 = vector.broadcast %cst_52 : f32 to vector<1x8x128xf32>
    %114 = vector.broadcast %112 : f32 to vector<1x8x128xf32>
    %115 = arith.mulf %114, %113 : vector<1x8x128xf32>
    %c0_53 = arith.constant 0 : index
    %c0_54 = arith.constant 0 : index
    %c0_55 = arith.constant 0 : index
    %116 = vector.load %arg17[%c0_53, %c0_54, %c0_55] : memref<1x8x128xf32, #tpu.memory_space<vmem>>, vector<1x8x128xf32>
    tpu.vector_store %arg17[%c0_53, %c0_54, %c0_55], %115 {strides = array<i32>} : memref<1x8x128xf32, #tpu.memory_space<vmem>>, vector<1x8x128xf32>,
    return
  }
  func.func @transform_0(%arg0: i32) -> (i32, i32) {
    %c0_i32 = arith.constant 0 : i32
    %c0_i32_0 = arith.constant 0 : i32
    return %arg0, %c0_i32 : i32, i32
  }
  func.func @transform_1(%arg0: i32) -> (i32, i32) {
    %c0_i32 = arith.constant 0 : i32
    %c0_i32_0 = arith.constant 0 : i32
    return %arg0, %c0_i32 : i32, i32
  }
  func.func @transform_2(%arg0: i32) -> (i32, i32) {
    %c0_i32 = arith.constant 0 : i32
    %c0_i32_0 = arith.constant 0 : i32
    %c0_i32_1 = arith.constant 0 : i32
    return %c0_i32, %c0_i32_0 : i32, i32
  }
  func.func @transform_3(%arg0: i32) -> (i32, i32) {
    %c0_i32 = arith.constant 0 : i32
    %c0_i32_0 = arith.constant 0 : i32
    %c0_i32_1 = arith.constant 0 : i32
    return %c0_i32, %c0_i32_0 : i32, i32
  }
  func.func @transform_4(%arg0: i32) -> (i32, i32) {
    %c0_i32 = arith.constant 0 : i32
    %c0_i32_0 = arith.constant 0 : i32
    %c0_i32_1 = arith.constant 0 : i32
    return %c0_i32, %c0_i32_0 : i32, i32
  }
  func.func @transform_5(%arg0: i32) -> (i32, i32) {
    %c0_i32 = arith.constant 0 : i32
    %c0_i32_0 = arith.constant 0 : i32
    %c0_i32_1 = arith.constant 0 : i32
    return %c0_i32, %c0_i32_0 : i32, i32
  }
  func.func @transform_6(%arg0: i32) -> (i32, i32) {
    %c0_i32 = arith.constant 0 : i32
    %c0_i32_0 = arith.constant 0 : i32
    %c0_i32_1 = arith.constant 0 : i32
    return %c0_i32, %c0_i32_0 : i32, i32
  }
  func.func @transform_7(%arg0: i32) -> (i32, i32) {
    %c0_i32 = arith.constant 0 : i32
    %c0_i32_0 = arith.constant 0 : i32
    %c0_i32_1 = arith.constant 0 : i32
    return %c0_i32, %c0_i32_0 : i32, i32
  }
  func.func @transform_8(%arg0: i32) -> (i32, i32) {
    %c0_i32 = arith.constant 0 : i32
    %c0_i32_0 = arith.constant 0 : i32
    %c0_i32_1 = arith.constant 0 : i32
    return %c0_i32, %c0_i32_0 : i32, i32
  }
  func.func @transform_9(%arg0: i32) -> (i32, i32) {
    %c0_i32 = arith.constant 0 : i32
    %c0_i32_0 = arith.constant 0 : i32
    %c0_i32_1 = arith.constant 0 : i32
    return %c0_i32, %c0_i32_0 : i32, i32
  }
  func.func @transform_10(%arg0: i32) -> (i32, i32) {
    %c0_i32 = arith.constant 0 : i32
    %c0_i32_0 = arith.constant 0 : i32
    %c0_i32_1 = arith.constant 0 : i32
    return %c0_i32, %c0_i32_0 : i32, i32
  }
  func.func @transform_11(%arg0: i32) -> (i32, i32) {
    %c0_i32 = arith.constant 0 : i32
    %c0_i32_0 = arith.constant 0 : i32
    %c0_i32_1 = arith.constant 0 : i32
    return %c0_i32, %c0_i32_0 : i32, i32
  }
  func.func @transform_12(%arg0: i32) -> (i32, i32) {
    %c0_i32 = arith.constant 0 : i32
    %c0_i32_0 = arith.constant 0 : i32
    %c0_i32_1 = arith.constant 0 : i32
    return %c0_i32, %c0_i32_0 : i32, i32
  }
  func.func @transform_13(%arg0: i32) -> (i32, i32) {
    %c0_i32 = arith.constant 0 : i32
    %c0_i32_0 = arith.constant 0 : i32
    %c0_i32_1 = arith.constant 0 : i32
    return %c0_i32, %c0_i32_0 : i32, i32
  }
  func.func @transform_14(%arg0: i32) -> (i32, i32) {
    %c0_i32 = arith.constant 0 : i32
    %c0_i32_0 = arith.constant 0 : i32
    %c0_i32_1 = arith.constant 0 : i32
    return %c0_i32, %c0_i32_0 : i32, i32
  }
  func.func @transform_15(%arg0: i32) -> (i32, i32) {
    %c0_i32 = arith.constant 0 : i32
    %c0_i32_0 = arith.constant 0 : i32
    %c0_i32_1 = arith.constant 0 : i32
    return %c0_i32, %c0_i32_0 : i32, i32
  }
  func.func @transform_16(%arg0: i32) -> (i32, i32, i32) {
    %c0_i32 = arith.constant 0 : i32
    %c0_i32_0 = arith.constant 0 : i32
    %c0_i32_1 = arith.constant 0 : i32
    return %arg0, %c0_i32, %c0_i32_0 : i32, i32, i32
  }
}

</mosaic_0001>

<bundles_post_ra>
// kernel: vae_forward_pallas.1
= control target key start
LH: loop header
LB: loop body
LE: loop exit
PB: predicated region body
PF: predicated region fallthrough
CT: control target
= control target key end

     0   :  { %vm2260_vm1 = vcmask 7168   ;;  %s3934_s2 = inlined_call_operand.vmem [shape: bf16[128,128], index: 2, kind: input, shape index: {}]   ;;  %s3935_s0 = inlined_call_operand.vmem [shape: f32[128,128], index: 0, kind: input, shape index: {}]   ;;  %s3936_s4 = inlined_call_operand.vmem [shape: bf16[128,128], index: 4, kind: input, shape index: {}]   ;;  %s3937_s3 = inlined_call_operand.vmem [shape: f32[1,128], index: 3, kind: input, shape index: {}]   ;;  %s3938_s8 = inlined_call_operand.vmem [shape: bf16[128,128], index: 8, kind: input, shape index: {}]   ;;  %s3939_s6 = inlined_call_operand.vmem [shape: bf16[128,128], index: 6, kind: input, shape index: {}]   ;;  %s3940_s10 = inlined_call_operand.vmem [shape: bf16[128,128], index: 10, kind: input, shape index: {}]   ;;  %s3941_s5 = inlined_call_operand.vmem [shape: f32[1,128], index: 5, kind: input, shape index: {}]   ;;  %s3942_s9 = inlined_call_operand.vmem [shape: f32[1,128], index: 9, kind: input, shape index: {}]   ;;  %s3943_s7 = inlined_call_operand.vmem [shape: f32[1,128], index: 7, kind: input, shape index: {}]   ;;  %s3944_s1 = inlined_call_operand.vmem [shape: f32[128,128], index: 1, kind: input, shape index: {}]   ;;  %s3945_s12 = inlined_call_operand.vmem [shape: bf16[128,128], index: 12, kind: input, shape index: {}]   ;;  %s3946_s11 = inlined_call_operand.vmem [shape: f32[1,128], index: 11, kind: input, shape index: {}]   ;;  %s3947_s14 = inlined_call_operand.vmem [shape: bf16[128,128], index: 14, kind: input, shape index: {}]   ;;  %s3948_s13 = inlined_call_operand.vmem [shape: f32[1,128], index: 13, kind: input, shape index: {}]   ;;  %s3949_s15 = inlined_call_operand.vmem [shape: f32[1,128], index: 15, kind: input, shape index: {}]   ;;  %s3950_s16 = inlined_call_operand.vmem [shape: f32[1,8,128], index: 16, kind: output, shape index: {}]  }
   0x1   :  { %3952 = sst [smem:[#allocation2_spill]] %s3934_s2  ;;  %v54_v4 = vld [vmem:[%s3935_s0] sm:$0xff]  ;;  %v55_v5 = vld [vmem:[%s3935_s0 + $0x8] sm:$0xff]  ;;  %v56_v11 = vld [vmem:[%s3935_s0 + $0x10] sm:$0xff] }
   0x2   :  { %s3953_s23 = sld [smem:[#allocation2_spill]]  ;;  %v86_v6 = vpack.c.bf16 %v55_v5, %v54_v4  ;;  %v57_v12 = vld [vmem:[%s3935_s0 + $0x18] sm:$0xff]  ;;  %v58_v13 = vld [vmem:[%s3935_s0 + $0x20] sm:$0xff]  ;;  %v59_v14 = vld [vmem:[%s3935_s0 + $0x28] sm:$0xff] }
   0x3   :  { %v87_v15 = vpack.c.bf16 %v57_v12, %v56_v11  ;;  %v88_v16 = vpack.c.bf16 %v59_v14, %v58_v13  ;;  %v60_v17 = vld [vmem:[%s3935_s0 + $0x30] sm:$0xff]  ;;  %v61_v18 = vld [vmem:[%s3935_s0 + $0x38] sm:$0xff]  ;;  %v62_v19 = vld [vmem:[%s3935_s0 + $0x40] sm:$0xff] }
   0x4   :  { %2594 = vmatprep.mubr.bf16.mxu0 %v86_v6  ;;  %v63_v20 = vld [vmem:[%s3935_s0 + $0x48] sm:$0xff]  ;;  %v89_v21 = vpack.c.bf16 %v61_v18, %v60_v17  ;;  %v64_v23 = vld [vmem:[%s3935_s0 + $0x50] sm:$0xff]  ;;  %v65_v24 = vld [vmem:[%s3935_s0 + $0x58] sm:$0xff] }
   0x5   :  { %v90_v22 = vpack.c.bf16 %v63_v20, %v62_v19  ;;  %v66_v25 = vld [vmem:[%s3935_s0 + $0x60] sm:$0xff]  ;;  %v67_v26 = vld [vmem:[%s3935_s0 + $0x68] sm:$0xff]  ;;  %v91_v27 = vpack.c.bf16 %v65_v24, %v64_v23  ;;  %v68_v29 = vld [vmem:[%s3935_s0 + $0x70] sm:$0xff] }
   0x6   :  { %v92_v28 = vpack.c.bf16 %v67_v26, %v66_v25  ;;  %v69_v30 = vld [vmem:[%s3935_s0 + $0x78] sm:$0xff]  ;;  %v2828_v32 = vld [vmem:[%s3936_s4] sm:$0xff]   ;;  %v2829_v33 = vld [vmem:[%s3936_s4 + $0x8] sm:$0xff]  }
   0x7   :  { %v93_v31 = vpack.c.bf16 %v69_v30, %v68_v29  ;;  %2610 = vmatprep.subr.bf16.mxu1 %v2828_v32  ;;  %v2830_v34 = vld [vmem:[%s3936_s4 + $0x10] sm:$0xff]   ;;  %v2831_v35 = vld [vmem:[%s3936_s4 + $0x18] sm:$0xff]   ;;  %v2832_v36 = vld [vmem:[%s3936_s4 + $0x20] sm:$0xff]  }
   0x8   :  { %v2820_v0 = vld [vmem:[%s3953_s23] sm:$0xff]   ;;  %v2821_v1 = vld [vmem:[%s3953_s23 + $0x8] sm:$0xff]   ;;  %v2822_v2 = vld [vmem:[%s3953_s23 + $0x10] sm:$0xff]   ;;  %2611 = vmatpush3.bf16.msra.mxu1 %v2828_v32 }
   0x9   :  { %2578 = vmatprep.subr.bf16.mxu0 %v2820_v0  ;;  %v2823_v3 = vld [vmem:[%s3953_s23 + $0x18] sm:$0xff]   ;;  %v2824_v7 = vld [vmem:[%s3953_s23 + $0x20] sm:$0xff]   ;;  %v2825_v8 = vld [vmem:[%s3953_s23 + $0x28] sm:$0xff]   ;;  %2612 = vmatprep.subr.bf16.mxu1 %v2829_v33 }
   0xa   :  { %2579 = vmatpush3.bf16.msra.mxu0 %v2820_v0  ;;  %v2826_v9 = vld [vmem:[%s3953_s23 + $0x30] sm:$0xff]   ;;  %v2827_v10 = vld [vmem:[%s3953_s23 + $0x38] sm:$0xff]   ;;  %v2833_v37 = vld [vmem:[%s3936_s4 + $0x28] sm:$0xff]  }
   0xb   :  { %2580 = vmatprep.subr.bf16.mxu0 %v2821_v1  ;;  %v2834_v38 = vld [vmem:[%s3936_s4 + $0x30] sm:$0xff]   ;;  %v2835_v39 = vld [vmem:[%s3936_s4 + $0x38] sm:$0xff]   ;;  %v3353_v40 = vld [vmem:[%s3937_s3] ss:$0 sm:$0xff] }
   0xc   :  { %2613 = vmatpush3.bf16.msra.mxu1 %v2829_v33 }
   0xd   :  { %2614 = vmatprep.subr.bf16.mxu1 %v2830_v34 }
   0xe   :  { %2581 = vmatpush3.bf16.msra.mxu0 %v2821_v1 }
   0xf   :  { %2582 = vmatprep.subr.bf16.mxu0 %v2822_v2 }
  0x10   :  { %2615 = vmatpush3.bf16.msra.mxu1 %v2830_v34 }
  0x11   :  { %2616 = vmatprep.subr.bf16.mxu1 %v2831_v35 }
  0x12   :  { %2583 = vmatpush3.bf16.msra.mxu0 %v2822_v2 }
  0x13   :  { %2584 = vmatprep.subr.bf16.mxu0 %v2823_v3 }
  0x14   :  { %2617 = vmatpush3.bf16.msra.mxu1 %v2831_v35 }
  0x15   :  { %2618 = vmatprep.subr.bf16.mxu1 %v2832_v36 }
  0x16   :  { %2585 = vmatpush3.bf16.msra.mxu0 %v2823_v3 }
  0x17   :  { %2586 = vmatprep.subr.bf16.mxu0 %v2824_v7 }
  0x18   :  { %2619 = vmatpush3.bf16.msra.mxu1 %v2832_v36 }
  0x19   :  { %2620 = vmatprep.subr.bf16.mxu1 %v2833_v37 }
  0x1a   :  { %2587 = vmatpush3.bf16.msra.mxu0 %v2824_v7 }
  0x1b   :  { %2588 = vmatprep.subr.bf16.mxu0 %v2825_v8 }
  0x1c   :  { %2621 = vmatpush3.bf16.msra.mxu1 %v2833_v37 }
  0x1d   :  { %2622 = vmatprep.subr.bf16.mxu1 %v2834_v38 }
  0x1e   :  { %2589 = vmatpush3.bf16.msra.mxu0 %v2825_v8 }
  0x1f   :  { %2590 = vmatprep.subr.bf16.mxu0 %v2826_v9 }
  0x20   :  { %2623 = vmatpush3.bf16.msra.mxu1 %v2834_v38 }
  0x21   :  { %2624 = vmatprep.subr.bf16.mxu1 %v2835_v39 }
  0x22   :  { %2591 = vmatpush3.bf16.msra.mxu0 %v2826_v9 }
  0x23   :  { %2592 = vmatprep.subr.bf16.mxu0 %v2827_v10 }
  0x24   :  { %2625 = vmatpush3.bf16.msra.mxu1 %v2835_v39 }
  0x26   :  { %2593 = vmatpush3.bf16.msra.mxu0 %v2827_v10 }
  0x29   :  { %2595 = vmatmul.mubr.bf16.vlgmr.msra.gmra.mrb[0].mxu0 %v87_v15 }
  0x2a   :  { %2598 = vmatprep.mubr.bf16.mxu0 %v88_v16 }
  0x31   :  { %2599 = vmatmul.mubr.bf16.gmra.mrb[4].mxu0 %v89_v21 }
  0x32   :  { %2602 = vmatprep.mubr.bf16.mxu0 %v90_v22 }
  0x39   :  { %2603 = vmatmul.mubr.bf16.gmra.mrb[8].mxu0 %v91_v27 }
  0x3a   :  { %2606 = vmatprep.mubr.bf16.mxu0 %v92_v28 }
  0x41   :  { %2607 = vmatmul.mubr.bf16.gmra.mrb[12].mxu0 %v93_v31 }
  0xfc   :  { %v2596_v41 = vpop.f32.mrb[0].mxu0 }
  0xfd   :  { %v3356_v42 = vadd.f32 %v2596_v41, %v3353_v40  ;;  %v199_v43 = vpop.f32.mrb[1].mxu0 }
  0xfe   :  { %v3359_v44 = vadd.f32 %v3353_v40, %v199_v43  ;;  %v2597_v45 = vpop.f32.mrb[2].mxu0 }
  0xff   :  { %v2318_v46 = vmul.f32 -1.442695, %v3356_v42  ;;  %v3363_v47 = vadd.f32 %v2597_v45, %v3353_v40  ;;  %v202_v48 = vpop.f32.mrb[3].mxu0 }
 0x100   :  { %v2316_v49 = vmul.f32 -1.442695, %v3359_v44  ;;  %v3367_v50 = vadd.f32 %v3353_v40, %v202_v48 }
 0x101   :  { %2876 = vpow2.f32 %v2318_v46  ;;  %v2319_v51 = vmul.f32 -1.442695, %v3363_v47 }
 0x102   :  { %2878 = vpow2.f32 %v2316_v49  ;;  %v2317_v52 = vmul.f32 -1.442695, %v3367_v50 }
 0x103   :  { %2880 = vpow2.f32 %v2319_v51 }
 0x104   :  { %2882 = vpow2.f32 %v2317_v52  ;;  %v2600_v53 = vpop.f32.mrb[4].mxu0 }
 0x105   :  { %v3372_v54 = vadd.f32 %v2600_v53, %v3353_v40  ;;  %v215_v55 = vpop.f32.mrb[5].mxu0 }
 0x106   :  { %v3375_v56 = vadd.f32 %v3353_v40, %v215_v55  ;;  %v2601_v57 = vpop.f32.mrb[6].mxu0 }
 0x107   :  { %v2322_v58 = vmul.f32 -1.442695, %v3372_v54  ;;  %v3379_v59 = vadd.f32 %v2601_v57, %v3353_v40  ;;  %v218_v60 = vpop.f32.mrb[7].mxu0 }
 0x108   :  { %v2320_v61 = vmul.f32 -1.442695, %v3375_v56  ;;  %v3383_v62 = vadd.f32 %v3353_v40, %v218_v60 }
 0x109   :  { %2884 = vpow2.f32 %v2322_v58  ;;  %v2323_v63 = vmul.f32 -1.442695, %v3379_v59 }
 0x10a   :  { %2886 = vpow2.f32 %v2320_v61  ;;  %v2321_v0 = vmul.f32 -1.442695, %v3383_v62 }
 0x10b   :  { %v2877_v1 = vpop.eup %2876  ;;  %2888 = vpow2.f32 %v2323_v63 }
 0x10c   :  { %v2879_v2 = vpop.eup %2878  ;;  %v312_v3 = vadd.f32 1.0, %v2877_v1  ;;  %2890 = vpow2.f32 %v2321_v0  ;;  %v2604_v4 = vpop.f32.mrb[8].mxu0 }
 0x10d   :  { %v2881_v5 = vpop.eup %2880  ;;  %v310_v6 = vadd.f32 1.0, %v2879_v2  ;;  %v3388_v7 = vadd.f32 %v2604_v4, %v3353_v40  ;;  %v231_v8 = vpop.f32.mrb[9].mxu0 }
 0x10e   :  { %v2883_v9 = vpop.eup %2882  ;;  %2892 = vrcp.f32 %v312_v3  ;;  %v313_v10 = vadd.f32 1.0, %v2881_v5  ;;  %v3391_v11 = vadd.f32 %v3353_v40, %v231_v8  ;;  %v2605_v12 = vpop.f32.mrb[10].mxu0 }
 0x10f   :  { %2894 = vrcp.f32 %v310_v6  ;;  %v311_v13 = vadd.f32 1.0, %v2883_v9  ;;  %v2326_v14 = vmul.f32 -1.442695, %v3388_v7  ;;  %v3395_v15 = vadd.f32 %v2605_v12, %v3353_v40  ;;  %v234_v16 = vpop.f32.mrb[11].mxu0 }
 0x110   :  { %2896 = vrcp.f32 %v313_v10  ;;  %v2324_v17 = vmul.f32 -1.442695, %v3391_v11  ;;  %v3399_v18 = vadd.f32 %v3353_v40, %v234_v16 }
 0x111   :  { %2898 = vrcp.f32 %v311_v13  ;;  %v2327_v19 = vmul.f32 -1.442695, %v3395_v15 }
 0x112   :  { %2900 = vpow2.f32 %v2326_v14  ;;  %v2325_v20 = vmul.f32 -1.442695, %v3399_v18 }
 0x113   :  { %v2885_v21 = vpop.eup %2884  ;;  %2902 = vpow2.f32 %v2324_v17 }
 0x114   :  { %v2887_v22 = vpop.eup %2886  ;;  %v316_v23 = vadd.f32 1.0, %v2885_v21  ;;  %2904 = vpow2.f32 %v2327_v19  ;;  %v2608_v24 = vpop.f32.mrb[12].mxu0 }
 0x115   :  { %v2889_v25 = vpop.eup %2888  ;;  %v314_v26 = vadd.f32 1.0, %v2887_v22  ;;  %2906 = vpow2.f32 %v2325_v20  ;;  %v3404_v27 = vadd.f32 %v2608_v24, %v3353_v40  ;;  %v247_v28 = vpop.f32.mrb[13].mxu0 }
 0x116   :  { %v2891_v29 = vpop.eup %2890  ;;  %2908 = vrcp.f32 %v316_v23  ;;  %v317_v30 = vadd.f32 1.0, %v2889_v25  ;;  %v3407_v31 = vadd.f32 %v3353_v40, %v247_v28  ;;  %v2609_v32 = vpop.f32.mrb[14].mxu0 }
 0x117   :  { %2910 = vrcp.f32 %v314_v26  ;;  %v315_v33 = vadd.f32 1.0, %v2891_v29  ;;  %v2330_v34 = vmul.f32 -1.442695, %v3404_v27  ;;  %v3411_v35 = vadd.f32 %v2609_v32, %v3353_v40  ;;  %v250_v36 = vpop.f32.mrb[15].mxu0 }
 0x118   :  { %v2893_v37 = vpop.eup %2892  ;;  %2912 = vrcp.f32 %v317_v30  ;;  %v2328_v38 = vmul.f32 -1.442695, %v3407_v31  ;;  %v3415_v39 = vadd.f32 %v3353_v40, %v250_v36 }
 0x119   :  { %v2895_v41 = vpop.eup %2894  ;;  %2914 = vrcp.f32 %v315_v33  ;;  %v2331_v43 = vmul.f32 -1.442695, %v3411_v35  ;;  %v360_v49 = vmul.f32 %v2893_v37, %v3356_v42  ;;  %v2840_v37 = vld [vmem:[%s3938_s8 + $0x10] sm:$0xff]  }
 0x11a   :  { %v2897_v45 = vpop.eup %2896  ;;  %2916 = vpow2.f32 %v2330_v34  ;;  %v2329_v46 = vmul.f32 -1.442695, %v3415_v39  ;;  %v358_v53 = vmul.f32 %v2895_v41, %v3359_v44  ;;  %v2843_v41 = vld [vmem:[%s3939_s6 + $0x18] sm:$0xff]  }
 0x11b   :  { %v2899_v48 = vpop.eup %2898  ;;  %v361_v51 = vmul.f32 %v2897_v45, %v3363_v47  ;;  %2918 = vpow2.f32 %v2328_v38  ;;  %v2841_v38 = vld [vmem:[%s3939_s6 + $0x10] sm:$0xff]   ;;  %v2845_v45 = vld [vmem:[%s3939_s6 + $0x20] sm:$0xff]  }
 0x11c   :  { %v2901_v52 = vpop.eup %2900  ;;  %v359_v40 = vmul.f32 %v2899_v48, %v3367_v50  ;;  %2920 = vpow2.f32 %v2331_v43  ;;  %v2844_v43 = vld [vmem:[%s3938_s8 + $0x20] sm:$0xff]   ;;  %v2847_v48 = vld [vmem:[%s3939_s6 + $0x28] sm:$0xff]  }
 0x11d   :  { %v2903_v55 = vpop.eup %2902  ;;  %v375_v57 = vpack.c.bf16 %v361_v51, %v360_v49  ;;  %v320_v58 = vadd.f32 1.0, %v2901_v52  ;;  %2922 = vpow2.f32 %v2329_v46  ;;  %v2846_v46 = vld [vmem:[%s3938_s8 + $0x28] sm:$0xff]   ;;  %v2848_v49 = vld [vmem:[%s3938_s8 + $0x30] sm:$0xff]   ;;  %v2850_v52 = vld [vmem:[%s3938_s8 + $0x38] sm:$0xff]  }
 0x11e   :  { %v2905_v60 = vpop.eup %2904  ;;  %v374_v61 = vpack.c.bf16 %v359_v40, %v358_v53  ;;  %v318_v63 = vadd.f32 1.0, %v2903_v55  ;;  %v2849_v51 = vld [vmem:[%s3939_s6 + $0x30] sm:$0xff]   ;;  %v2851_v53 = vld [vmem:[%s3939_s6 + $0x38] sm:$0xff]   ;;  %v3486_v40 = vld [vmem:[%s3940_s10] sm:$0xff]  }
 0x11f   :  { %v2907_v0 = vpop.eup %2906  ;;  %2924 = vrcp.f32 %v320_v58  ;;  %v321_v1 = vadd.f32 1.0, %v2905_v60  ;;  %v3492_v55 = vld [vmem:[%s3941_s5] ss:$0 sm:$0xff] }
 0x120   :  { %v2909_v42 = vpop.eup %2908  ;;  %2626 = vmatprep.mubr.bf16.mxu1 %v374_v61  ;;  %2926 = vrcp.f32 %v318_v63  ;;  %v319_v47 = vadd.f32 1.0, %v2907_v0 }
 0x121   :  { %v2911_v2 = vpop.eup %2910  ;;  %2627 = vmatmul.mubr.bf16.vlgmr.msra.gmra.mrb[0].mxu1 %v375_v57  ;;  %v364_v44 = vmul.f32 %v2909_v42, %v3372_v54  ;;  %2928 = vrcp.f32 %v321_v1 }
 0x122   :  { %v2913_v50 = vpop.eup %2912  ;;  %v362_v3 = vmul.f32 %v2911_v2, %v3375_v56  ;;  %2930 = vrcp.f32 %v319_v47 }
 0x123   :  { %v2915_v4 = vpop.eup %2914  ;;  %v365_v5 = vmul.f32 %v2913_v50, %v3379_v59 }
 0x124   :  { %v2917_v6 = vpop.eup %2916  ;;  %v363_v8 = vmul.f32 %v2915_v4, %v3383_v62 }
 0x125   :  { %v2919_v9 = vpop.eup %2918  ;;  %v324_v10 = vadd.f32 1.0, %v2917_v6  ;;  %v377_v12 = vpack.c.bf16 %v365_v5, %v364_v44 }
 0x126   :  { %v2921_v13 = vpop.eup %2920  ;;  %v322_v14 = vadd.f32 1.0, %v2919_v9  ;;  %v376_v16 = vpack.c.bf16 %v363_v8, %v362_v3 }
 0x127   :  { %v2923_v17 = vpop.eup %2922  ;;  %2932 = vrcp.f32 %v324_v10  ;;  %v325_v54 = vadd.f32 1.0, %v2921_v13 }
 0x128   :  { %2934 = vrcp.f32 %v322_v14  ;;  %v323_v19 = vadd.f32 1.0, %v2923_v17  ;;  %2630 = vmatprep.mubr.bf16.mxu1 %v376_v16 }
 0x129   :  { %v2925_v56 = vpop.eup %2924  ;;  %2936 = vrcp.f32 %v325_v54  ;;  %2631 = vmatmul.mubr.bf16.gmra.mrb[4].mxu1 %v377_v12 }
 0x12a   :  { %v2927_v20 = vpop.eup %2926  ;;  %v368_v59 = vmul.f32 %v2925_v56, %v3388_v7  ;;  %2938 = vrcp.f32 %v323_v19 }
 0x12b   :  { %v2929_v62 = vpop.eup %2928  ;;  %v366_v21 = vmul.f32 %v2927_v20, %v3391_v11 }
 0x12c   :  { %v2931_v22 = vpop.eup %2930  ;;  %v369_v23 = vmul.f32 %v2929_v62, %v3395_v15 }
 0x12d   :  { %v367_v24 = vmul.f32 %v2931_v22, %v3399_v18  ;;  %v2836_v18 = vld [vmem:[%s3938_s8] sm:$0xff]  }
 0x12e   :  { %v379_v25 = vpack.c.bf16 %v369_v23, %v368_v59  ;;  %2674 = vmatprep.subr.bf16.mxu1 %v2836_v18 }
 0x12f   :  { %v378_v26 = vpack.c.bf16 %v367_v24, %v366_v21  ;;  %2675 = vmatpush3.bf16.msra.mxu1 %v2836_v18 }
 0x131   :  { %v2933_v28 = vpop.eup %2932  ;;  %2634 = vmatprep.mubr.bf16.mxu1 %v378_v26 }
 0x132   :  { %v2935_v29 = vpop.eup %2934  ;;  %v372_v30 = vmul.f32 %v2933_v28, %v3404_v27  ;;  %2635 = vmatmul.mubr.bf16.gmra.mrb[8].mxu1 %v379_v25  ;;  %v2837_v27 = vld [vmem:[%s3939_s6] sm:$0xff]  }
 0x133   :  { %v2937_v32 = vpop.eup %2936  ;;  %v370_v7 = vmul.f32 %v2935_v29, %v3407_v31  ;;  %2642 = vmatprep.subr.bf16.mxu0 %v2837_v27  ;;  %v2838_v31 = vld [vmem:[%s3938_s8 + $0x8] sm:$0xff]  }
 0x134   :  { %v2939_v33 = vpop.eup %2938  ;;  %v373_v34 = vmul.f32 %v2937_v32, %v3411_v35  ;;  %2643 = vmatpush3.bf16.msra.mxu0 %v2837_v27  ;;  %v2839_v35 = vld [vmem:[%s3939_s6 + $0x8] sm:$0xff]   ;;  %2676 = vmatprep.subr.bf16.mxu1 %v2838_v31 }
 0x135   :  { %v371_v11 = vmul.f32 %v2939_v33, %v3415_v39  ;;  %2644 = vmatprep.subr.bf16.mxu0 %v2839_v35  ;;  %2677 = vmatpush3.bf16.msra.mxu1 %v2838_v31  ;;  %v2842_v39 = vld [vmem:[%s3938_s8 + $0x18] sm:$0xff]  }
 0x136   :  { %v381_v36 = vpack.c.bf16 %v373_v34, %v372_v30  ;;  %2678 = vmatprep.subr.bf16.mxu1 %v2840_v37 }
 0x137   :  { %v380_v15 = vpack.c.bf16 %v371_v11, %v370_v7 }
 0x138   :  { %2645 = vmatpush3.bf16.msra.mxu0 %v2839_v35 }
 0x139   :  { %2638 = vmatprep.mubr.bf16.mxu1 %v380_v15  ;;  %2646 = vmatprep.subr.bf16.mxu0 %v2841_v38 }
 0x13a   :  { %2639 = vmatmul.mubr.bf16.gmra.mrb[12].mxu1 %v381_v36 }
 0x13b   :  { %2679 = vmatpush3.bf16.msra.mxu1 %v2840_v37 }
 0x13c   :  { %2647 = vmatpush3.bf16.msra.mxu0 %v2841_v38  ;;  %2680 = vmatprep.subr.bf16.mxu1 %v2842_v39 }
 0x13d   :  { %2648 = vmatprep.subr.bf16.mxu0 %v2843_v41 }
 0x13f   :  { %2681 = vmatpush3.bf16.msra.mxu1 %v2842_v39 }
 0x140   :  { %2649 = vmatpush3.bf16.msra.mxu0 %v2843_v41  ;;  %2682 = vmatprep.subr.bf16.mxu1 %v2844_v43 }
 0x141   :  { %2650 = vmatprep.subr.bf16.mxu0 %v2845_v45 }
 0x143   :  { %2683 = vmatpush3.bf16.msra.mxu1 %v2844_v43 }
 0x144   :  { %2651 = vmatpush3.bf16.msra.mxu0 %v2845_v45  ;;  %2684 = vmatprep.subr.bf16.mxu1 %v2846_v46 }
 0x145   :  { %2652 = vmatprep.subr.bf16.mxu0 %v2847_v48 }
 0x147   :  { %2685 = vmatpush3.bf16.msra.mxu1 %v2846_v46 }
 0x148   :  { %2653 = vmatpush3.bf16.msra.mxu0 %v2847_v48  ;;  %2686 = vmatprep.subr.bf16.mxu1 %v2848_v49 }
 0x149   :  { %2654 = vmatprep.subr.bf16.mxu0 %v2849_v51 }
 0x14b   :  { %2687 = vmatpush3.bf16.msra.mxu1 %v2848_v49 }
 0x14c   :  { %2655 = vmatpush3.bf16.msra.mxu0 %v2849_v51  ;;  %2688 = vmatprep.subr.bf16.mxu1 %v2850_v52 }
 0x14d   :  { %2656 = vmatprep.subr.bf16.mxu0 %v2851_v53 }
 0x14f   :  { %2689 = vmatpush3.bf16.msra.mxu1 %v2850_v52 }
 0x150   :  { %2657 = vmatpush3.bf16.msra.mxu0 %v2851_v53 }
 0x151   :  { %2706 = vmatprep.subr.bf16.mxu0 %v3486_v40 }
 0x1f4   :  { %v2628_v57 = vpop.f32.mrb[0].mxu1 }
 0x1f5   :  { %v3495_v58 = vadd.f32 %v2628_v57, %v3492_v55  ;;  %v487_v60 = vpop.f32.mrb[1].mxu1 }
 0x1f6   :  { %v3498_v61 = vadd.f32 %v3492_v55, %v487_v60  ;;  %v2629_v63 = vpop.f32.mrb[2].mxu1 }
 0x1f7   :  { %v2343_v0 = vmul.f32 -1.442695, %v3495_v58  ;;  %v3502_v1 = vadd.f32 %v2629_v63, %v3492_v55  ;;  %v490_v42 = vpop.f32.mrb[3].mxu1 }
 0x1f8   :  { %v2341_v47 = vmul.f32 -1.442695, %v3498_v61  ;;  %v3506_v2 = vadd.f32 %v3492_v55, %v490_v42 }
 0x1f9   :  { %2940 = vpow2.f32 %v2343_v0  ;;  %v2344_v44 = vmul.f32 -1.442695, %v3502_v1 }
 0x1fa   :  { %2942 = vpow2.f32 %v2341_v47  ;;  %v2342_v50 = vmul.f32 -1.442695, %v3506_v2 }
 0x1fb   :  { %2944 = vpow2.f32 %v2344_v44 }
 0x1fc   :  { %2946 = vpow2.f32 %v2342_v50  ;;  %v2632_v3 = vpop.f32.mrb[4].mxu1 }
 0x1fd   :  { %v3511_v4 = vadd.f32 %v2632_v3, %v3492_v55  ;;  %v503_v5 = vpop.f32.mrb[5].mxu1 }
 0x1fe   :  { %v3514_v6 = vadd.f32 %v3492_v55, %v503_v5  ;;  %v2633_v8 = vpop.f32.mrb[6].mxu1 }
 0x1ff   :  { %v2347_v9 = vmul.f32 -1.442695, %v3511_v4  ;;  %v3518_v10 = vadd.f32 %v2633_v8, %v3492_v55  ;;  %v506_v12 = vpop.f32.mrb[7].mxu1 }
 0x200   :  { %v2345_v13 = vmul.f32 -1.442695, %v3514_v6  ;;  %v3522_v14 = vadd.f32 %v3492_v55, %v506_v12 }
 0x201   :  { %2948 = vpow2.f32 %v2347_v9  ;;  %v2348_v16 = vmul.f32 -1.442695, %v3518_v10 }
 0x202   :  { %2950 = vpow2.f32 %v2345_v13  ;;  %v2346_v17 = vmul.f32 -1.442695, %v3522_v14 }
 0x203   :  { %v2941_v54 = vpop.eup %2940  ;;  %2952 = vpow2.f32 %v2348_v16 }
 0x204   :  { %v2943_v19 = vpop.eup %2942  ;;  %v600_v56 = vadd.f32 1.0, %v2941_v54  ;;  %2954 = vpow2.f32 %v2346_v17 }
 0x205   :  { %v2945_v20 = vpop.eup %2944  ;;  %v598_v59 = vadd.f32 1.0, %v2943_v19  ;;  %v2636_v62 = vpop.f32.mrb[8].mxu1 }
 0x206   :  { %v2947_v21 = vpop.eup %2946  ;;  %2956 = vrcp.f32 %v600_v56  ;;  %v601_v22 = vadd.f32 1.0, %v2945_v20  ;;  %v3527_v23 = vadd.f32 %v2636_v62, %v3492_v55  ;;  %v519_v24 = vpop.f32.mrb[9].mxu1 }
 0x207   :  { %2958 = vrcp.f32 %v598_v59  ;;  %v599_v25 = vadd.f32 1.0, %v2947_v21  ;;  %v3530_v26 = vadd.f32 %v3492_v55, %v519_v24  ;;  %v2637_v28 = vpop.f32.mrb[10].mxu1 }
 0x208   :  { %2960 = vrcp.f32 %v601_v22  ;;  %v2351_v29 = vmul.f32 -1.442695, %v3527_v23  ;;  %v3534_v30 = vadd.f32 %v2637_v28, %v3492_v55  ;;  %v522_v32 = vpop.f32.mrb[11].mxu1 }
 0x209   :  { %2962 = vrcp.f32 %v599_v25  ;;  %v2349_v7 = vmul.f32 -1.442695, %v3530_v26  ;;  %v3538_v33 = vadd.f32 %v3492_v55, %v522_v32 }
 0x20a   :  { %2964 = vpow2.f32 %v2351_v29  ;;  %v2352_v34 = vmul.f32 -1.442695, %v3534_v30 }
 0x20b   :  { %v2949_v11 = vpop.eup %2948  ;;  %2966 = vpow2.f32 %v2349_v7  ;;  %v2350_v36 = vmul.f32 -1.442695, %v3538_v33 }
 0x20c   :  { %v2951_v15 = vpop.eup %2950  ;;  %v604_v18 = vadd.f32 1.0, %v2949_v11  ;;  %2968 = vpow2.f32 %v2352_v34 }
 0x20d   :  { %v2953_v27 = vpop.eup %2952  ;;  %v602_v31 = vadd.f32 1.0, %v2951_v15  ;;  %2970 = vpow2.f32 %v2350_v36  ;;  %v2640_v35 = vpop.f32.mrb[12].mxu1 }
 0x20e   :  { %v2955_v37 = vpop.eup %2954  ;;  %2972 = vrcp.f32 %v604_v18  ;;  %v605_v38 = vadd.f32 1.0, %v2953_v27  ;;  %v3543_v39 = vadd.f32 %v2640_v35, %v3492_v55  ;;  %v535_v41 = vpop.f32.mrb[13].mxu1 }
 0x20f   :  { %2974 = vrcp.f32 %v602_v31  ;;  %v603_v43 = vadd.f32 1.0, %v2955_v37  ;;  %v3546_v45 = vadd.f32 %v3492_v55, %v535_v41  ;;  %v2641_v46 = vpop.f32.mrb[14].mxu1 }
 0x210   :  { %v2957_v48 = vpop.eup %2956  ;;  %2976 = vrcp.f32 %v605_v38  ;;  %v2355_v49 = vmul.f32 -1.442695, %v3543_v39  ;;  %v3550_v51 = vadd.f32 %v2641_v46, %v3492_v55  ;;  %v538_v52 = vpop.f32.mrb[15].mxu1 }
 0x211   :  { %v2959_v53 = vpop.eup %2958  ;;  %2978 = vrcp.f32 %v603_v43  ;;  %v2353_v57 = vmul.f32 -1.442695, %v3546_v45  ;;  %v3554_v60 = vadd.f32 %v3492_v55, %v538_v52  ;;  %v648_v47 = vmul.f32 %v2957_v48, %v3495_v58  ;;  %v2857_v52 = vld [vmem:[%s3940_s10 + $0x28] sm:$0xff]  }
 0x212   :  { %v2961_v63 = vpop.eup %2960  ;;  %2980 = vpow2.f32 %v2355_v49  ;;  %v2356_v0 = vmul.f32 -1.442695, %v3550_v51  ;;  %v646_v5 = vmul.f32 %v2959_v53, %v3498_v61  ;;  %v2858_v53 = vld [vmem:[%s3940_s10 + $0x30] sm:$0xff]  }
 0x213   :  { %v2963_v42 = vpop.eup %2962  ;;  %v649_v44 = vmul.f32 %v2961_v63, %v3502_v1  ;;  %2982 = vpow2.f32 %v2353_v57  ;;  %v2354_v50 = vmul.f32 -1.442695, %v3554_v60  ;;  %v2853_v1 = vld [vmem:[%s3940_s10 + $0x8] sm:$0xff]   ;;  %v2859_v57 = vld [vmem:[%s3940_s10 + $0x38] sm:$0xff]  }
 0x214   :  { %v2965_v3 = vpop.eup %2964  ;;  %v647_v8 = vmul.f32 %v2963_v42, %v3506_v2  ;;  %2984 = vpow2.f32 %v2356_v0 }
 0x215   :  { %v2967_v55 = vpop.eup %2966  ;;  %v663_v9 = vpack.c.bf16 %v649_v44, %v648_v47  ;;  %v608_v12 = vadd.f32 1.0, %v2965_v3  ;;  %2986 = vpow2.f32 %v2354_v50 }
 0x216   :  { %v2969_v13 = vpop.eup %2968  ;;  %v662_v16 = vpack.c.bf16 %v647_v8, %v646_v5  ;;  %v606_v17 = vadd.f32 1.0, %v2967_v55 }
 0x217   :  { %v2971_v54 = vpop.eup %2970  ;;  %2988 = vrcp.f32 %v608_v12  ;;  %v609_v58 = vadd.f32 1.0, %v2969_v13 }
 0x218   :  { %v2973_v19 = vpop.eup %2972  ;;  %2658 = vmatprep.mubr.bf16.mxu0 %v662_v16  ;;  %2690 = vmatprep.mubr.bf16.mxu1 %v662_v16  ;;  %2990 = vrcp.f32 %v606_v17  ;;  %v607_v61 = vadd.f32 1.0, %v2971_v54 }
 0x219   :  { %v2975_v2 = vpop.eup %2974  ;;  %2659 = vmatmul.mubr.bf16.vlgmr.msra.gmra.mrb[16].mxu0 %v663_v9  ;;  %2691 = vmatmul.mubr.bf16.vlgmr.msra.gmra.mrb[16].mxu1 %v663_v9  ;;  %v652_v56 = vmul.f32 %v2973_v19, %v3511_v4  ;;  %2992 = vrcp.f32 %v609_v58 }
 0x21a   :  { %v2977_v20 = vpop.eup %2976  ;;  %v650_v59 = vmul.f32 %v2975_v2, %v3514_v6  ;;  %2994 = vrcp.f32 %v607_v61  ;;  %2707 = vmatpush3.bf16.msra.mxu0 %v3486_v40 }
 0x21b   :  { %v2979_v62 = vpop.eup %2978  ;;  %v653_v21 = vmul.f32 %v2977_v20, %v3518_v10  ;;  %2708 = vmatprep.subr.bf16.mxu0 %v2853_v1 }
 0x21c   :  { %v2981_v22 = vpop.eup %2980  ;;  %v651_v24 = vmul.f32 %v2979_v62, %v3522_v14 }
 0x21d   :  { %v2983_v25 = vpop.eup %2982  ;;  %v612_v28 = vadd.f32 1.0, %v2981_v22  ;;  %v665_v29 = vpack.c.bf16 %v653_v21, %v652_v56  ;;  %v3611_v56 = vld [vmem:[%s3943_s7] ss:$0 sm:$0xff] }
 0x21e   :  { %v2985_v32 = vpop.eup %2984  ;;  %v610_v7 = vadd.f32 1.0, %v2983_v25  ;;  %v664_v4 = vpack.c.bf16 %v651_v24, %v650_v59  ;;  %2709 = vmatpush3.bf16.msra.mxu0 %v2853_v1 }
 0x21f   :  { %v2987_v34 = vpop.eup %2986  ;;  %2996 = vrcp.f32 %v612_v28  ;;  %v613_v6 = vadd.f32 1.0, %v2985_v32  ;;  %v72_v32 = vld [vmem:[%s3944_s1 + $0x10] sm:$0xff] }
 0x220   :  { %2998 = vrcp.f32 %v610_v7  ;;  %v611_v11 = vadd.f32 1.0, %v2987_v34  ;;  %2694 = vmatprep.mubr.bf16.mxu1 %v664_v4  ;;  %2662 = vmatprep.mubr.bf16.mxu0 %v664_v4  ;;  %v70_v34 = vld [vmem:[%s3944_s1] sm:$0xff] }
 0x221   :  { %v2989_v40 = vpop.eup %2988  ;;  %3000 = vrcp.f32 %v613_v6  ;;  %2695 = vmatmul.mubr.bf16.gmra.mrb[20].mxu1 %v665_v29  ;;  %2663 = vmatmul.mubr.bf16.gmra.mrb[20].mxu0 %v665_v29 }
 0x222   :  { %v2991_v10 = vpop.eup %2990  ;;  %v656_v14 = vmul.f32 %v2989_v40, %v3527_v23  ;;  %3002 = vrcp.f32 %v611_v11  ;;  %v73_v40 = vld [vmem:[%s3944_s1 + $0x18] sm:$0xff] }
 0x223   :  { %v2993_v36 = vpop.eup %2992  ;;  %v654_v15 = vmul.f32 %v2991_v10, %v3530_v26 }
 0x224   :  { %v2995_v18 = vpop.eup %2994  ;;  %v657_v27 = vmul.f32 %v2993_v36, %v3534_v30 }
 0x225   :  { %v655_v31 = vmul.f32 %v2995_v18, %v3538_v33  ;;  %v71_v18 = vld [vmem:[%s3944_s1 + $0x8] sm:$0xff] }
 0x226   :  { %v667_v35 = vpack.c.bf16 %v657_v27, %v656_v14 }
 0x227   :  { %v666_v37 = vpack.c.bf16 %v655_v31, %v654_v15 }
 0x229   :  { %v2997_v38 = vpop.eup %2996  ;;  %2698 = vmatprep.mubr.bf16.mxu1 %v666_v37  ;;  %2666 = vmatprep.mubr.bf16.mxu0 %v666_v37 }
 0x22a   :  { %v2999_v41 = vpop.eup %2998  ;;  %v660_v43 = vmul.f32 %v2997_v38, %v3543_v39  ;;  %2699 = vmatmul.mubr.bf16.gmra.mrb[24].mxu1 %v667_v35  ;;  %2667 = vmatmul.mubr.bf16.gmra.mrb[24].mxu0 %v667_v35  ;;  %v2854_v39 = vld [vmem:[%s3940_s10 + $0x10] sm:$0xff]  }
 0x22b   :  { %v3001_v23 = vpop.eup %3000  ;;  %v658_v46 = vmul.f32 %v2999_v41, %v3546_v45  ;;  %2710 = vmatprep.subr.bf16.mxu0 %v2854_v39  ;;  %v2855_v45 = vld [vmem:[%s3940_s10 + $0x18] sm:$0xff]  }
 0x22c   :  { %v3003_v48 = vpop.eup %3002  ;;  %v661_v26 = vmul.f32 %v3001_v23, %v3550_v51  ;;  %2711 = vmatpush3.bf16.msra.mxu0 %v2854_v39  ;;  %v2856_v51 = vld [vmem:[%s3940_s10 + $0x20] sm:$0xff]  }
 0x22d   :  { %v659_v30 = vmul.f32 %v3003_v48, %v3554_v60  ;;  %2712 = vmatprep.subr.bf16.mxu0 %v2855_v45  ;;  %v3599_v60 = vld [vmem:[%s3942_s9] ss:$0 sm:$0xff] }
 0x22e   :  { %v669_v49 = vpack.c.bf16 %v661_v26, %v660_v43 }
 0x22f   :  { %v668_v33 = vpack.c.bf16 %v659_v30, %v658_v46 }
 0x230   :  { %2713 = vmatpush3.bf16.msra.mxu0 %v2855_v45 }
 0x231   :  { %2702 = vmatprep.mubr.bf16.mxu1 %v668_v33  ;;  %2670 = vmatprep.mubr.bf16.mxu0 %v668_v33 }
 0x232   :  { %2703 = vmatmul.mubr.bf16.gmra.mrb[28].mxu1 %v669_v49  ;;  %2671 = vmatmul.mubr.bf16.gmra.mrb[28].mxu0 %v669_v49 }
 0x233   :  { %2714 = vmatprep.subr.bf16.mxu0 %v2856_v51 }
 0x234   :  { %2715 = vmatpush3.bf16.msra.mxu0 %v2856_v51 }
 0x235   :  { %2716 = vmatprep.subr.bf16.mxu0 %v2857_v52 }
 0x238   :  { %2717 = vmatpush3.bf16.msra.mxu0 %v2857_v52 }
 0x239   :  { %2718 = vmatprep.subr.bf16.mxu0 %v2858_v53 }
 0x23c   :  { %2719 = vmatpush3.bf16.msra.mxu0 %v2858_v53 }
 0x23d   :  { %2720 = vmatprep.subr.bf16.mxu0 %v2859_v57 }
 0x240   :  { %2721 = vmatpush3.bf16.msra.mxu0 %v2859_v57 }
 0x2ec   :  { %v2660_v63 = vpop.f32.mrb[16].mxu0  ;;  %v2692_v0 = vpop.f32.mrb[16].mxu1 }
 0x2ed   :  { %v952_v42 = vadd.f32 %v2692_v0, %v3599_v60  ;;  %v775_v47 = vpop.f32.mrb[17].mxu0  ;;  %v943_v44 = vpop.f32.mrb[17].mxu1  ;;  %v784_v14 = vadd.f32 %v2660_v63, %v3611_v56 }
 0x2ee   :  { %v944_v50 = vadd.f32 %v3599_v60, %v943_v44  ;;  %v2661_v3 = vpop.f32.mrb[18].mxu0  ;;  %v2693_v5 = vpop.f32.mrb[18].mxu1  ;;  %v776_v7 = vadd.f32 %v3611_v56, %v775_v47 }
 0x2ef   :  { %v1010_v8 = vmul.f32 1.442695, %v952_v42  ;;  %v955_v55 = vadd.f32 %v2693_v5, %v3599_v60  ;;  %v778_v9 = vpop.f32.mrb[19].mxu0  ;;  %v946_v12 = vpop.f32.mrb[19].mxu1  ;;  %v787_v15 = vadd.f32 %v2661_v3, %v3611_v56 }
 0x2f0   :  { %v1006_v13 = vmul.f32 1.442695, %v944_v50  ;;  %v947_v16 = vadd.f32 %v3599_v60, %v946_v12  ;;  %v2017_v31 = vmul.f32 %v776_v7, %v776_v7  ;;  %v779_v35 = vadd.f32 %v3611_v56, %v778_v9  ;;  %v76_v9 = vld [vmem:[%s3944_s1 + $0x30] sm:$0xff] }
 0x2f1   :  { %3004 = vpow2.f32 %v1010_v8  ;;  %v1012_v17 = vmul.f32 1.442695, %v955_v55  ;;  %v2081_v48 = vmul.f32 2.0, %v944_v50 }
 0x2f2   :  { %3006 = vpow2.f32 %v1006_v13  ;;  %v1008_v54 = vmul.f32 1.442695, %v947_v16  ;;  %v74_v16 = vld [vmem:[%s3944_s1 + $0x20] sm:$0xff] }
 0x2f3   :  { %3008 = vpow2.f32 %v1012_v17 }
 0x2f4   :  { %3010 = vpow2.f32 %v1008_v54  ;;  %v2696_v58 = vpop.f32.mrb[20].mxu1  ;;  %v2664_v1 = vpop.f32.mrb[20].mxu0 }
 0x2f5   :  { %v968_v19 = vadd.f32 %v2696_v58, %v3599_v60  ;;  %v959_v61 = vpop.f32.mrb[21].mxu1  ;;  %v3606_v2 = vpop.f32.mrb[21].mxu0  ;;  %v800_v44 = vadd.f32 %v2664_v1, %v3611_v56 }
 0x2f6   :  { %v960_v20 = vadd.f32 %v3599_v60, %v959_v61  ;;  %v2697_v59 = vpop.f32.mrb[22].mxu1  ;;  %v3614_v62 = vpop.f32.mrb[22].mxu0  ;;  %v792_v17 = vadd.f32 %v3611_v56, %v3606_v2  ;;  %v77_v61 = vld [vmem:[%s3944_s1 + $0x38] sm:$0xff] }
 0x2f7   :  { %v1018_v21 = vmul.f32 1.442695, %v968_v19  ;;  %v971_v22 = vadd.f32 %v2697_v59, %v3599_v60  ;;  %v962_v24 = vpop.f32.mrb[23].mxu1  ;;  %v3617_v25 = vpop.f32.mrb[23].mxu0 }
 0x2f8   :  { %v1014_v28 = vmul.f32 1.442695, %v960_v20  ;;  %v963_v29 = vadd.f32 %v3599_v60, %v962_v24 }
 0x2f9   :  { %3012 = vpow2.f32 %v1018_v21  ;;  %v1020_v4 = vmul.f32 1.442695, %v971_v22  ;;  %v803_v21 = vadd.f32 %v3614_v62, %v3611_v56  ;;  %v75_v22 = vld [vmem:[%s3944_s1 + $0x28] sm:$0xff] }
 0x2fa   :  { %3014 = vpow2.f32 %v1014_v28  ;;  %v1016_v6 = vmul.f32 1.442695, %v963_v29  ;;  %v795_v29 = vadd.f32 %v3611_v56, %v3617_v25 }
 0x2fb   :  { %v3005_v11 = vpop.eup %3004  ;;  %3016 = vpow2.f32 %v1020_v4 }
 0x2fc   :  { %v3007_v10 = vpop.eup %3006  ;;  %v1040_v36 = vmul.f32 %v3005_v11, %v72_v32  ;;  %3018 = vpow2.f32 %v1016_v6 }
 0x2fd   :  { %v3009_v27 = vpop.eup %3008  ;;  %v2033_v37 = vmul.f32 %v3007_v10, %v3007_v10  ;;  %v1038_v38 = vmul.f32 %v3007_v10, %v70_v34  ;;  %v2700_v41 = vpop.f32.mrb[24].mxu1 }
 0x2fe   :  { %v3636_v43 = vpop.f32.mrb[24].mxu0  ;;  %v3011_v23 = vpop.eup %3010  ;;  %v1041_v46 = vmul.f32 %v3009_v27, %v73_v40  ;;  %v1056_v26 = vadd.f32 %v1040_v36, %v784_v14  ;;  %v984_v30 = vadd.f32 %v2700_v41, %v3599_v60 }
 0x2ff   :  { %v975_v49 = vpop.f32.mrb[25].mxu1  ;;  %v3639_v33 = vpop.f32.mrb[25].mxu0  ;;  %v2049_v39 = vadd.f32 %v2033_v37, %v2017_v31  ;;  %v1039_v45 = vmul.f32 %v3011_v23, %v71_v18  ;;  %v1054_v51 = vadd.f32 %v1038_v38, %v776_v7 }
 0x300   :  { %v976_v52 = vadd.f32 %v3599_v60, %v975_v49  ;;  %v2701_v53 = vpop.f32.mrb[26].mxu1  ;;  %v3642_v57 = vpop.f32.mrb[26].mxu0  ;;  %v1057_v63 = vadd.f32 %v1041_v46, %v787_v15  ;;  %v1026_v0 = vmul.f32 1.442695, %v984_v30  ;;  %v80_v46 = vld [vmem:[%s3944_s1 + $0x50] sm:$0xff]  ;;  %v816_v30 = vadd.f32 %v3636_v43, %v3611_v56  ;;  %v78_v49 = vld [vmem:[%s3944_s1 + $0x40] sm:$0xff] }
 0x301   :  { %v987_v42 = vadd.f32 %v2701_v53, %v3599_v60  ;;  %v978_v47 = vpop.f32.mrb[27].mxu1  ;;  %v3646_v50 = vpop.f32.mrb[27].mxu0  ;;  %v2450_v3 = vadd.f32 -1.0, %v2049_v39  ;;  %v1055_v5 = vadd.f32 %v1039_v45, %v779_v35  ;;  %v819_v43 = vadd.f32 %v3642_v57, %v3611_v56  ;;  %v84_v57 = vld [vmem:[%s3944_s1 + $0x70] sm:$0xff] }
 0x302   :  { %v1022_v8 = vmul.f32 1.442695, %v976_v52  ;;  %v979_v55 = vadd.f32 %v3599_v60, %v978_v47  ;;  %v1071_v12 = vpack.c.bf16 %v1057_v63, %v1056_v26  ;;  %3020 = vpow2.f32 %v1026_v0  ;;  %v79_v63 = vld [vmem:[%s3944_s1 + $0x48] sm:$0xff] }
 0x303   :  { %v1028_v13 = vmul.f32 1.442695, %v987_v42  ;;  %v3013_v54 = vpop.eup %3012  ;;  %v2097_v58 = vsub.f32 %v2450_v3, %v2081_v48  ;;  %v1070_v1 = vpack.c.bf16 %v1055_v5, %v1054_v51  ;;  %v81_v51 = vld [vmem:[%s3944_s1 + $0x58] sm:$0xff] }
 0x304   :  { %3022 = vpow2.f32 %v1022_v8  ;;  %v1024_v19 = vmul.f32 1.442695, %v979_v55  ;;  %v3015_v20 = vpop.eup %3014  ;;  %v1044_v59 = vmul.f32 %v3013_v54, %v76_v9  ;;  %v85_v54 = vld [vmem:[%s3944_s1 + $0x78] sm:$0xff] }
 0x305   :  { %3024 = vpow2.f32 %v1028_v13  ;;  %v3017_v2 = vpop.eup %3016  ;;  %2113 = vadd.xlane.f32.xlu0 %v2097_v58  ;;  %2722 = vmatprep.mubr.bf16.mxu0 %v1070_v1  ;;  %v1042_v24 = vmul.f32 %v3015_v20, %v74_v16  ;;  %v2704_v28 = vpop.f32.mrb[28].mxu1  ;;  %v82_v13 = vld [vmem:[%s3944_s1 + $0x60] sm:$0xff]  ;;  %v83_v20 = vld [vmem:[%s3944_s1 + $0x68] sm:$0xff] }
 0x306   :  { %3026 = vpow2.f32 %v1024_v19  ;;  %v2672_v32 = vpop.f32.mrb[28].mxu0  ;;  %v3019_v7 = vpop.eup %3018  ;;  %2723 = vmatmul.mubr.bf16.vlgmr.msra.gmra.mrb[32].mxu0 %v1071_v12  ;;  %v1060_v4 = vadd.f32 %v1044_v59, %v800_v44  ;;  %v1000_v34 = vadd.f32 %v2704_v28, %v3599_v60  ;;  %v1045_v62 = vmul.f32 %v3017_v2, %v77_v61 }
 0x307   :  { %v991_v6 = vpop.f32.mrb[29].mxu1  ;;  %v823_v11 = vpop.f32.mrb[29].mxu0  ;;  %v1058_v40 = vadd.f32 %v1042_v24, %v792_v17  ;;  %v1043_v14 = vmul.f32 %v3019_v7, %v75_v22  ;;  %v832_v12 = vadd.f32 %v2672_v32, %v3611_v56 }
 0x308   :  { %v992_v10 = vadd.f32 %v3599_v60, %v991_v6  ;;  %v2705_v36 = vpop.f32.mrb[30].mxu1  ;;  %v2673_v15 = vpop.f32.mrb[30].mxu0  ;;  %v1034_v18 = vmul.f32 1.442695, %v1000_v34  ;;  %v1061_v27 = vadd.f32 %v1045_v62, %v803_v21  ;;  %v824_v17 = vadd.f32 %v3611_v56, %v823_v11  ;;  %v2860_v6 = vld [vmem:[%s3945_s12] sm:$0xff]   ;;  %v2862_v11 = vld [vmem:[%s3945_s12 + $0x10] sm:$0xff]  }
 0x309   :  { %v1003_v31 = vadd.f32 %v2705_v36, %v3599_v60  ;;  %v994_v25 = vpop.f32.mrb[31].mxu1  ;;  %v826_v35 = vpop.f32.mrb[31].mxu0  ;;  %v1059_v38 = vadd.f32 %v1043_v14, %v795_v29  ;;  %v835_v61 = vadd.f32 %v2673_v15, %v3611_v56  ;;  %2738 = vmatprep.subr.bf16.mxu1 %v2860_v6  ;;  %v2865_v14 = vld [vmem:[%s3945_s12 + $0x28] sm:$0xff]   ;;  %v2866_v36 = vld [vmem:[%s3945_s12 + $0x30] sm:$0xff]   ;;  %v2867_v15 = vld [vmem:[%s3945_s12 + $0x38] sm:$0xff]  }
 0x30a   :  { %v1030_v37 = vmul.f32 1.442695, %v992_v10  ;;  %v995_v41 = vadd.f32 %v3599_v60, %v994_v25  ;;  %3028 = vpow2.f32 %v1034_v18  ;;  %v1073_v48 = vpack.c.bf16 %v1061_v27, %v1060_v4  ;;  %2739 = vmatpush3.bf16.msra.mxu1 %v2860_v6  ;;  %v2864_v10 = vld [vmem:[%s3945_s12 + $0x20] sm:$0xff]  }
 0x30b   :  { %v1036_v23 = vmul.f32 1.442695, %v1003_v31  ;;  %v1072_v39 = vpack.c.bf16 %v1059_v38, %v1058_v40  ;;  %v808_v60 = vadd.f32 %v3611_v56, %v3639_v33  ;;  %v811_v33 = vadd.f32 %v3611_v56, %v3646_v50  ;;  %v2863_v40 = vld [vmem:[%s3945_s12 + $0x18] sm:$0xff]   ;;  %v3734_v18 = vld [vmem:[%s3946_s11] ss:$0 sm:$0xff] }
 0x30c   :  { %3030 = vpow2.f32 %v1030_v37  ;;  %v1032_v26 = vmul.f32 1.442695, %v995_v41  ;;  %v3021_v45 = vpop.eup %3020  ;;  %v827_v22 = vadd.f32 %v3611_v56, %v826_v35  ;;  %v2861_v56 = vld [vmem:[%s3945_s12 + $0x8] sm:$0xff]  }
 0x30d   :  { %3032 = vpow2.f32 %v1036_v23  ;;  %v1048_v53 = vmul.f32 %v3021_v45, %v80_v46  ;;  %2726 = vmatprep.mubr.bf16.mxu0 %v1072_v39  ;;  %2740 = vmatprep.subr.bf16.mxu1 %v2861_v56 }
 0x30e   :  { %v3023_v52 = vpop.eup %3022  ;;  %3034 = vpow2.f32 %v1032_v26  ;;  %2727 = vmatmul.mubr.bf16.gmra.mrb[36].mxu0 %v1073_v48  ;;  %2741 = vmatpush3.bf16.msra.mxu1 %v2861_v56 }
 0x30f   :  { %v3025_v0 = vpop.eup %3024  ;;  %v1046_v42 = vmul.f32 %v3023_v52, %v78_v49  ;;  %v1064_v44 = vadd.f32 %v1048_v53, %v816_v30  ;;  %2742 = vmatprep.subr.bf16.mxu1 %v2862_v11 }
 0x310   :  { %v3027_v47 = vpop.eup %3026  ;;  %v1049_v3 = vmul.f32 %v3025_v0, %v81_v51 }
 0x311   :  { %v1062_v5 = vadd.f32 %v1046_v42, %v808_v60  ;;  %v1047_v8 = vmul.f32 %v3027_v47, %v79_v63 }
 0x312   :  { %v1065_v55 = vadd.f32 %v1049_v3, %v819_v43  ;;  %2743 = vmatpush3.bf16.msra.mxu1 %v2862_v11 }
 0x313   :  { %v1063_v9 = vadd.f32 %v1047_v8, %v811_v33  ;;  %2744 = vmatprep.subr.bf16.mxu1 %v2863_v40 }
 0x314   :  { %v1075_v16 = vpack.c.bf16 %v1065_v55, %v1064_v44  ;;  %v3029_v50 = vpop.eup %3028 }
 0x315   :  { %v1074_v58 = vpack.c.bf16 %v1063_v9, %v1062_v5  ;;  %v1052_v19 = vmul.f32 %v3029_v50, %v84_v57 }
 0x316   :  { %v3031_v1 = vpop.eup %3030  ;;  %2745 = vmatpush3.bf16.msra.mxu1 %v2863_v40 }
 0x317   :  { %v3033_v59 = vpop.eup %3032  ;;  %v1050_v21 = vmul.f32 %v3031_v1, %v82_v13  ;;  %2730 = vmatprep.mubr.bf16.mxu0 %v1074_v58  ;;  %v1068_v24 = vadd.f32 %v1052_v19, %v832_v12  ;;  %2746 = vmatprep.subr.bf16.mxu1 %v2864_v10 }
 0x318   :  { %v3035_v2 = vpop.eup %3034  ;;  %v1053_v28 = vmul.f32 %v3033_v59, %v85_v54  ;;  %2731 = vmatmul.mubr.bf16.gmra.mrb[40].mxu0 %v1075_v16 }
 0x319   :  { %v1066_v29 = vadd.f32 %v1050_v21, %v824_v17  ;;  %v1051_v32 = vmul.f32 %v3035_v2, %v83_v20 }
 0x31a   :  { %v1069_v7 = vadd.f32 %v1053_v28, %v835_v61  ;;  %2747 = vmatpush3.bf16.msra.mxu1 %v2864_v10 }
 0x31b   :  { %v1067_v4 = vadd.f32 %v1051_v32, %v827_v22  ;;  %2748 = vmatprep.subr.bf16.mxu1 %v2865_v14 }
 0x31c   :  { %v1077_v34 = vpack.c.bf16 %v1069_v7, %v1068_v24 }
 0x31d   :  { %v1076_v62 = vpack.c.bf16 %v1067_v4, %v1066_v29 }
 0x31e   :  { %2749 = vmatpush3.bf16.msra.mxu1 %v2865_v14 }
 0x31f   :  { %2734 = vmatprep.mubr.bf16.mxu0 %v1076_v62  ;;  %2750 = vmatprep.subr.bf16.mxu1 %v2866_v36 }
 0x320   :  { %2735 = vmatmul.mubr.bf16.gmra.mrb[44].mxu0 %v1077_v34 }
 0x322   :  { %2751 = vmatpush3.bf16.msra.mxu1 %v2866_v36 }
 0x323   :  { %2752 = vmatprep.subr.bf16.mxu1 %v2867_v15 }
 0x326   :  { %2753 = vmatpush3.bf16.msra.mxu1 %v2867_v15 }
 0x3d9   :  { %v2724_v27 = vpop.f32.mrb[32].mxu0 }
 0x3da   :  { %v3737_v31 = vadd.f32 %v2724_v27, %v3734_v18  ;;  %v1183_v25 = vpop.f32.mrb[33].mxu0 }
 0x3db   :  { %v3740_v35 = vadd.f32 %v3734_v18, %v1183_v25  ;;  %v2725_v37 = vpop.f32.mrb[34].mxu0 }
 0x3dc   :  { %v2386_v38 = vmul.f32 -1.442695, %v3737_v31  ;;  %v3744_v41 = vadd.f32 %v2725_v37, %v3734_v18  ;;  %v1186_v23 = vpop.f32.mrb[35].mxu0 }
 0x3dd   :  { %v2384_v46 = vmul.f32 -1.442695, %v3740_v35  ;;  %v3748_v48 = vadd.f32 %v3734_v18, %v1186_v23 }
 0x3de   :  { %3036 = vpow2.f32 %v2386_v38  ;;  %v2387_v26 = vmul.f32 -1.442695, %v3744_v41 }
 0x3df   :  { %3038 = vpow2.f32 %v2384_v46  ;;  %v2385_v30 = vmul.f32 -1.442695, %v3748_v48 }
 0x3e0   :  { %3040 = vpow2.f32 %v2387_v26 }
 0x3e1   :  { %3042 = vpow2.f32 %v2385_v30  ;;  %v2728_v49 = vpop.f32.mrb[36].mxu0 }
 0x3e2   :  { %v3753_v39 = vadd.f32 %v2728_v49, %v3734_v18  ;;  %v1199_v45 = vpop.f32.mrb[37].mxu0 }
 0x3e3   :  { %v3756_v60 = vadd.f32 %v3734_v18, %v1199_v45  ;;  %v2729_v51 = vpop.f32.mrb[38].mxu0 }
 0x3e4   :  { %v2390_v52 = vmul.f32 -1.442695, %v3753_v39  ;;  %v3760_v53 = vadd.f32 %v2729_v51, %v3734_v18  ;;  %v1202_v43 = vpop.f32.mrb[39].mxu0 }
 0x3e5   :  { %v2388_v63 = vmul.f32 -1.442695, %v3756_v60  ;;  %v3764_v0 = vadd.f32 %v3734_v18, %v1202_v43 }
 0x3e6   :  { %3044 = vpow2.f32 %v2390_v52  ;;  %v2391_v42 = vmul.f32 -1.442695, %v3760_v53 }
 0x3e7   :  { %3046 = vpow2.f32 %v2388_v63  ;;  %v2389_v33 = vmul.f32 -1.442695, %v3764_v0 }
 0x3e8   :  { %v3037_v47 = vpop.eup %3036  ;;  %3048 = vpow2.f32 %v2391_v42 }
 0x3e9   :  { %v3039_v44 = vpop.eup %3038  ;;  %v1296_v3 = vadd.f32 1.0, %v3037_v47  ;;  %3050 = vpow2.f32 %v2389_v33 }
 0x3ea   :  { %v3041_v5 = vpop.eup %3040  ;;  %v1294_v8 = vadd.f32 1.0, %v3039_v44 }
 0x3eb   :  { %v2732_v55 = vpop.f32.mrb[40].mxu0  ;;  %v3043_v9 = vpop.eup %3042  ;;  %3052 = vrcp.f32 %v1296_v3  ;;  %v1297_v57 = vadd.f32 1.0, %v3041_v5 }
 0x3ec   :  { %v3769_v12 = vadd.f32 %v2732_v55, %v3734_v18  ;;  %v1215_v13 = vpop.f32.mrb[41].mxu0  ;;  %3054 = vrcp.f32 %v1294_v8  ;;  %v1295_v16 = vadd.f32 1.0, %v3043_v9 }
 0x3ed   :  { %v3772_v50 = vadd.f32 %v3734_v18, %v1215_v13  ;;  %v2733_v17 = vpop.f32.mrb[42].mxu0  ;;  %3056 = vrcp.f32 %v1297_v57 }
 0x3ee   :  { %v2394_v54 = vmul.f32 -1.442695, %v3769_v12  ;;  %v3776_v58 = vadd.f32 %v2733_v17, %v3734_v18  ;;  %v1218_v1 = vpop.f32.mrb[43].mxu0  ;;  %3058 = vrcp.f32 %v1295_v16 }
 0x3ef   :  { %v2392_v19 = vmul.f32 -1.442695, %v3772_v50  ;;  %v3780_v61 = vadd.f32 %v3734_v18, %v1218_v1 }
 0x3f0   :  { %3060 = vpow2.f32 %v2394_v54  ;;  %v2395_v20 = vmul.f32 -1.442695, %v3776_v58  ;;  %v3045_v59 = vpop.eup %3044 }
 0x3f1   :  { %3062 = vpow2.f32 %v2392_v19  ;;  %v2393_v21 = vmul.f32 -1.442695, %v3780_v61  ;;  %v3047_v22 = vpop.eup %3046  ;;  %v1300_v2 = vadd.f32 1.0, %v3045_v59 }
 0x3f2   :  { %3064 = vpow2.f32 %v2395_v20  ;;  %v3049_v24 = vpop.eup %3048  ;;  %v1298_v28 = vadd.f32 1.0, %v3047_v22 }
 0x3f3   :  { %3066 = vpow2.f32 %v2393_v21  ;;  %v2736_v29 = vpop.f32.mrb[44].mxu0  ;;  %v3051_v32 = vpop.eup %3050  ;;  %v1301_v7 = vadd.f32 1.0, %v3049_v24 }
 0x3f4   :  { %3068 = vrcp.f32 %v1300_v2  ;;  %v3785_v4 = vadd.f32 %v2736_v29, %v3734_v18  ;;  %v1231_v34 = vpop.f32.mrb[45].mxu0  ;;  %v1299_v62 = vadd.f32 1.0, %v3051_v32 }
 0x3f5   :  { %3070 = vrcp.f32 %v1298_v28  ;;  %v3788_v6 = vadd.f32 %v3734_v18, %v1231_v34  ;;  %v2737_v56 = vpop.f32.mrb[46].mxu0  ;;  %v3053_v11 = vpop.eup %3052 }
 0x3f6   :  { %3072 = vrcp.f32 %v1301_v7  ;;  %v2398_v40 = vmul.f32 -1.442695, %v3785_v4  ;;  %v3792_v10 = vadd.f32 %v2737_v56, %v3734_v18  ;;  %v1234_v14 = vpop.f32.mrb[47].mxu0  ;;  %v3055_v36 = vpop.eup %3054  ;;  %v1344_v23 = vmul.f32 %v3053_v11, %v3737_v31 }
 0x3f7   :  { %3074 = vrcp.f32 %v1299_v62  ;;  %v2396_v15 = vmul.f32 -1.442695, %v3788_v6  ;;  %v3796_v27 = vadd.f32 %v3734_v18, %v1234_v14  ;;  %v3057_v25 = vpop.eup %3056  ;;  %v1342_v49 = vmul.f32 %v3055_v36, %v3740_v35  ;;  %v2872_v14 = vld [vmem:[%s3947_s14 + $0x20] sm:$0xff]   ;;  %v2873_v36 = vld [vmem:[%s3947_s14 + $0x28] sm:$0xff]  }
 0x3f8   :  { %3076 = vpow2.f32 %v2398_v40  ;;  %v2399_v37 = vmul.f32 -1.442695, %v3792_v10  ;;  %v3059_v38 = vpop.eup %3058  ;;  %v1345_v46 = vmul.f32 %v3057_v25, %v3744_v41  ;;  %v3843_v25 = vld [vmem:[%s3948_s13] ss:$0 sm:$0xff] }
 0x3f9   :  { %3078 = vpow2.f32 %v2396_v15  ;;  %v2397_v26 = vmul.f32 -1.442695, %v3796_v27  ;;  %v1343_v45 = vmul.f32 %v3059_v38, %v3748_v48  ;;  %v2874_v15 = vld [vmem:[%s3947_s14 + $0x30] sm:$0xff]  }
 0x3fa   :  { %v3061_v30 = vpop.eup %3060  ;;  %3080 = vpow2.f32 %v2399_v37  ;;  %v1359_v51 = vpack.c.bf16 %v1345_v46, %v1344_v23 }
 0x3fb   :  { %v3063_v18 = vpop.eup %3062  ;;  %v1304_v52 = vadd.f32 1.0, %v3061_v30  ;;  %3082 = vpow2.f32 %v2397_v26  ;;  %v1358_v63 = vpack.c.bf16 %v1343_v45, %v1342_v49 }
 0x3fc   :  { %v3065_v43 = vpop.eup %3064  ;;  %v1302_v42 = vadd.f32 1.0, %v3063_v18 }
 0x3fd   :  { %v3067_v33 = vpop.eup %3066  ;;  %3084 = vrcp.f32 %v1304_v52  ;;  %v1305_v31 = vadd.f32 1.0, %v3065_v43  ;;  %2754 = vmatprep.mubr.bf16.mxu1 %v1358_v63 }
 0x3fe   :  { %v3069_v41 = vpop.eup %3068  ;;  %3086 = vrcp.f32 %v1302_v42  ;;  %v1303_v47 = vadd.f32 1.0, %v3067_v33  ;;  %2755 = vmatmul.mubr.bf16.vlgmr.msra.gmra.mrb[32].mxu1 %v1359_v51 }
 0x3ff   :  { %v3071_v44 = vpop.eup %3070  ;;  %v1348_v35 = vmul.f32 %v3069_v41, %v3753_v39  ;;  %3088 = vrcp.f32 %v1305_v31 }
 0x400   :  { %v3073_v48 = vpop.eup %3072  ;;  %v1346_v3 = vmul.f32 %v3071_v44, %v3756_v60  ;;  %3090 = vrcp.f32 %v1303_v47 }
 0x401   :  { %v3075_v5 = vpop.eup %3074  ;;  %v1349_v8 = vmul.f32 %v3073_v48, %v3760_v53 }
 0x402   :  { %v3077_v55 = vpop.eup %3076  ;;  %v1347_v9 = vmul.f32 %v3075_v5, %v3764_v0 }
 0x403   :  { %v3079_v57 = vpop.eup %3078  ;;  %v1308_v13 = vadd.f32 1.0, %v3077_v55  ;;  %v1361_v16 = vpack.c.bf16 %v1349_v8, %v1348_v35 }
 0x404   :  { %v3081_v17 = vpop.eup %3080  ;;  %v1306_v54 = vadd.f32 1.0, %v3079_v57  ;;  %v1360_v1 = vpack.c.bf16 %v1347_v9, %v1346_v3 }
 0x405   :  { %v3083_v19 = vpop.eup %3082  ;;  %3092 = vrcp.f32 %v1308_v13  ;;  %v1309_v39 = vadd.f32 1.0, %v3081_v17 }
 0x406   :  { %3094 = vrcp.f32 %v1306_v54  ;;  %v1307_v20 = vadd.f32 1.0, %v3083_v19  ;;  %2758 = vmatprep.mubr.bf16.mxu1 %v1360_v1 }
 0x407   :  { %v3085_v60 = vpop.eup %3084  ;;  %3096 = vrcp.f32 %v1309_v39  ;;  %2759 = vmatmul.mubr.bf16.gmra.mrb[36].mxu1 %v1361_v16 }
 0x408   :  { %v3087_v59 = vpop.eup %3086  ;;  %v1352_v53 = vmul.f32 %v3085_v60, %v3769_v12  ;;  %3098 = vrcp.f32 %v1307_v20 }
 0x409   :  { %v3089_v0 = vpop.eup %3088  ;;  %v1350_v21 = vmul.f32 %v3087_v59, %v3772_v50 }
 0x40a   :  { %v3091_v22 = vpop.eup %3090  ;;  %v1353_v2 = vmul.f32 %v3089_v0, %v3776_v58 }
 0x40b   :  { %v1351_v24 = vmul.f32 %v3091_v22, %v3780_v61  ;;  %v2868_v61 = vld [vmem:[%s3947_s14] sm:$0xff]  }
 0x40c   :  { %v1363_v28 = vpack.c.bf16 %v1353_v2, %v1352_v53  ;;  %2770 = vmatprep.subr.bf16.mxu0 %v2868_v61  ;;  %2802 = vmatprep.subr.bf16.mxu1 %v2868_v61 }
 0x40d   :  { %v1362_v29 = vpack.c.bf16 %v1351_v24, %v1350_v21  ;;  %2771 = vmatpush3.bf16.msra.mxu0 %v2868_v61  ;;  %2810 = vmatpush3.bf16.msra.mxu1 %v2868_v61 }
 0x40f   :  { %v3093_v32 = vpop.eup %3092  ;;  %2762 = vmatprep.mubr.bf16.mxu1 %v1362_v29 }
 0x410   :  { %v3095_v7 = vpop.eup %3094  ;;  %v1356_v34 = vmul.f32 %v3093_v32, %v3785_v4  ;;  %2763 = vmatmul.mubr.bf16.gmra.mrb[40].mxu1 %v1363_v28  ;;  %v2869_v4 = vld [vmem:[%s3947_s14 + $0x8] sm:$0xff]  }
 0x411   :  { %v3097_v62 = vpop.eup %3096  ;;  %v1354_v12 = vmul.f32 %v3095_v7, %v3788_v6  ;;  %2772 = vmatprep.subr.bf16.mxu0 %v2869_v4  ;;  %2803 = vmatprep.subr.bf16.mxu1 %v2869_v4  ;;  %v2870_v6 = vld [vmem:[%s3947_s14 + $0x10] sm:$0xff]  }
 0x412   :  { %v3099_v56 = vpop.eup %3098  ;;  %v1357_v11 = vmul.f32 %v3097_v62, %v3792_v10  ;;  %2773 = vmatpush3.bf16.msra.mxu0 %v2869_v4  ;;  %2811 = vmatpush3.bf16.msra.mxu1 %v2869_v4  ;;  %v2871_v10 = vld [vmem:[%s3947_s14 + $0x18] sm:$0xff]  }
 0x413   :  { %v1355_v50 = vmul.f32 %v3099_v56, %v3796_v27  ;;  %2774 = vmatprep.subr.bf16.mxu0 %v2870_v6  ;;  %2804 = vmatprep.subr.bf16.mxu1 %v2870_v6  ;;  %v2875_v27 = vld [vmem:[%s3947_s14 + $0x38] sm:$0xff]  }
 0x414   :  { %v1365_v40 = vpack.c.bf16 %v1357_v11, %v1356_v34 }
 0x415   :  { %v1364_v58 = vpack.c.bf16 %v1355_v50, %v1354_v12 }
 0x416   :  { %2775 = vmatpush3.bf16.msra.mxu0 %v2870_v6  ;;  %2812 = vmatpush3.bf16.msra.mxu1 %v2870_v6 }
 0x417   :  { %2766 = vmatprep.mubr.bf16.mxu1 %v1364_v58  ;;  %2776 = vmatprep.subr.bf16.mxu0 %v2871_v10 }
 0x418   :  { %2767 = vmatmul.mubr.bf16.gmra.mrb[44].mxu1 %v1365_v40  ;;  %2805 = vmatprep.subr.bf16.mxu1 %v2871_v10 }
 0x41a   :  { %2777 = vmatpush3.bf16.msra.mxu0 %v2871_v10  ;;  %2813 = vmatpush3.bf16.msra.mxu1 %v2871_v10 }
 0x41b   :  { %2778 = vmatprep.subr.bf16.mxu0 %v2872_v14  ;;  %2806 = vmatprep.subr.bf16.mxu1 %v2872_v14 }
 0x41e   :  { %2779 = vmatpush3.bf16.msra.mxu0 %v2872_v14  ;;  %2814 = vmatpush3.bf16.msra.mxu1 %v2872_v14 }
 0x41f   :  { %2780 = vmatprep.subr.bf16.mxu0 %v2873_v36  ;;  %2807 = vmatprep.subr.bf16.mxu1 %v2873_v36 }
 0x422   :  { %2781 = vmatpush3.bf16.msra.mxu0 %v2873_v36  ;;  %2815 = vmatpush3.bf16.msra.mxu1 %v2873_v36 }
 0x423   :  { %2782 = vmatprep.subr.bf16.mxu0 %v2874_v15  ;;  %2808 = vmatprep.subr.bf16.mxu1 %v2874_v15 }
 0x426   :  { %2783 = vmatpush3.bf16.msra.mxu0 %v2874_v15  ;;  %2816 = vmatpush3.bf16.msra.mxu1 %v2874_v15 }
 0x427   :  { %2784 = vmatprep.subr.bf16.mxu0 %v2875_v27  ;;  %2809 = vmatprep.subr.bf16.mxu1 %v2875_v27 }
 0x42a   :  { %2785 = vmatpush3.bf16.msra.mxu0 %v2875_v27  ;;  %2817 = vmatpush3.bf16.msra.mxu1 %v2875_v27 }
 0x4d1   :  { %v2756_v37 = vpop.f32.mrb[32].mxu1 }
 0x4d2   :  { %v3846_v38 = vadd.f32 %v2756_v37, %v3843_v25  ;;  %v1471_v23 = vpop.f32.mrb[33].mxu1 }
 0x4d3   :  { %v3849_v46 = vadd.f32 %v3843_v25, %v1471_v23  ;;  %v2757_v26 = vpop.f32.mrb[34].mxu1 }
 0x4d4   :  { %v2411_v30 = vmul.f32 -1.442695, %v3846_v38  ;;  %v3853_v49 = vadd.f32 %v2757_v26, %v3843_v25  ;;  %v1474_v45 = vpop.f32.mrb[35].mxu1 }
 0x4d5   :  { %v2409_v18 = vmul.f32 -1.442695, %v3849_v46  ;;  %v3857_v51 = vadd.f32 %v3843_v25, %v1474_v45 }
 0x4d6   :  { %3100 = vpow2.f32 %v2411_v30  ;;  %v2412_v52 = vmul.f32 -1.442695, %v3853_v49 }
 0x4d7   :  { %3102 = vpow2.f32 %v2409_v18  ;;  %v2410_v43 = vmul.f32 -1.442695, %v3857_v51 }
 0x4d8   :  { %3104 = vpow2.f32 %v2412_v52 }
 0x4d9   :  { %3106 = vpow2.f32 %v2410_v43 }
 0x4da   :  { %v2760_v63 = vpop.f32.mrb[36].mxu1 }
 0x4db   :  { %v3862_v42 = vadd.f32 %v2760_v63, %v3843_v25  ;;  %v1487_v33 = vpop.f32.mrb[37].mxu1 }
 0x4dc   :  { %v3865_v31 = vadd.f32 %v3843_v25, %v1487_v33  ;;  %v2761_v41 = vpop.f32.mrb[38].mxu1 }
 0x4dd   :  { %v2415_v47 = vmul.f32 -1.442695, %v3862_v42  ;;  %v3869_v44 = vadd.f32 %v2761_v41, %v3843_v25  ;;  %v1490_v35 = vpop.f32.mrb[39].mxu1 }
 0x4de   :  { %v2413_v48 = vmul.f32 -1.442695, %v3865_v31  ;;  %v3873_v3 = vadd.f32 %v3843_v25, %v1490_v35 }
 0x4df   :  { %3108 = vpow2.f32 %v2415_v47  ;;  %v2416_v5 = vmul.f32 -1.442695, %v3869_v44 }
 0x4e0   :  { %3110 = vpow2.f32 %v2413_v48  ;;  %v2414_v8 = vmul.f32 -1.442695, %v3873_v3  ;;  %v3101_v55 = vpop.eup %3100 }
 0x4e1   :  { %3112 = vpow2.f32 %v2416_v5  ;;  %v3103_v9 = vpop.eup %3102  ;;  %v1584_v57 = vadd.f32 1.0, %v3101_v55 }
 0x4e2   :  { %3114 = vpow2.f32 %v2414_v8  ;;  %v3105_v13 = vpop.eup %3104  ;;  %v1582_v16 = vadd.f32 1.0, %v3103_v9 }
 0x4e3   :  { %v2764_v17 = vpop.f32.mrb[40].mxu1  ;;  %v3107_v54 = vpop.eup %3106  ;;  %3116 = vrcp.f32 %v1584_v57  ;;  %v1585_v1 = vadd.f32 1.0, %v3105_v13 }
 0x4e4   :  { %v3878_v19 = vadd.f32 %v2764_v17, %v3843_v25  ;;  %v1503_v39 = vpop.f32.mrb[41].mxu1  ;;  %3118 = vrcp.f32 %v1582_v16  ;;  %v1583_v20 = vadd.f32 1.0, %v3107_v54 }
 0x4e5   :  { %v3881_v60 = vadd.f32 %v3843_v25, %v1503_v39  ;;  %v2765_v59 = vpop.f32.mrb[42].mxu1  ;;  %3120 = vrcp.f32 %v1585_v1 }
 0x4e6   :  { %v2419_v53 = vmul.f32 -1.442695, %v3878_v19  ;;  %v3885_v0 = vadd.f32 %v2765_v59, %v3843_v25  ;;  %v1506_v21 = vpop.f32.mrb[43].mxu1  ;;  %3122 = vrcp.f32 %v1583_v20 }
 0x4e7   :  { %v2417_v22 = vmul.f32 -1.442695, %v3881_v60  ;;  %v3889_v2 = vadd.f32 %v3843_v25, %v1506_v21 }
 0x4e8   :  { %3124 = vpow2.f32 %v2419_v53  ;;  %v2420_v24 = vmul.f32 -1.442695, %v3885_v0 }
 0x4e9   :  { %v3109_v28 = vpop.eup %3108  ;;  %3126 = vpow2.f32 %v2417_v22  ;;  %v2418_v29 = vmul.f32 -1.442695, %v3889_v2 }
 0x4ea   :  { %v3111_v32 = vpop.eup %3110  ;;  %v1588_v7 = vadd.f32 1.0, %v3109_v28  ;;  %3128 = vpow2.f32 %v2420_v24 }
 0x4eb   :  { %v3113_v34 = vpop.eup %3112  ;;  %v1586_v62 = vadd.f32 1.0, %v3111_v32  ;;  %3130 = vpow2.f32 %v2418_v29  ;;  %v2768_v12 = vpop.f32.mrb[44].mxu1 }
 0x4ec   :  { %v3115_v56 = vpop.eup %3114  ;;  %3132 = vrcp.f32 %v1588_v7  ;;  %v1589_v11 = vadd.f32 1.0, %v3113_v34  ;;  %v3894_v50 = vadd.f32 %v2768_v12, %v3843_v25  ;;  %v1519_v40 = vpop.f32.mrb[45].mxu1 }
 0x4ed   :  { %3134 = vrcp.f32 %v1586_v62  ;;  %v1587_v58 = vadd.f32 1.0, %v3115_v56  ;;  %v3897_v61 = vadd.f32 %v3843_v25, %v1519_v40  ;;  %v2769_v4 = vpop.f32.mrb[46].mxu1  ;;  %v3117_v6 = vpop.eup %3116 }
 0x4ee   :  { %3136 = vrcp.f32 %v1589_v11  ;;  %v2423_v10 = vmul.f32 -1.442695, %v3894_v50  ;;  %v3901_v14 = vadd.f32 %v2769_v4, %v3843_v25  ;;  %v1522_v36 = vpop.f32.mrb[47].mxu1  ;;  %v3119_v15 = vpop.eup %3118  ;;  %v1632_v45 = vmul.f32 %v3117_v6, %v3846_v38 }
 0x4ef   :  { %3138 = vrcp.f32 %v1587_v58  ;;  %v2421_v27 = vmul.f32 -1.442695, %v3897_v61  ;;  %v3905_v37 = vadd.f32 %v3843_v25, %v1522_v36  ;;  %v3121_v23 = vpop.eup %3120  ;;  %v1630_v63 = vmul.f32 %v3119_v15, %v3849_v46 }
 0x4f0   :  { %3140 = vpow2.f32 %v2423_v10  ;;  %v2424_v26 = vmul.f32 -1.442695, %v3901_v14  ;;  %v3123_v30 = vpop.eup %3122  ;;  %v1633_v18 = vmul.f32 %v3121_v23, %v3853_v49 }
 0x4f1   :  { %3142 = vpow2.f32 %v2421_v27  ;;  %v2422_v52 = vmul.f32 -1.442695, %v3905_v37  ;;  %v1631_v33 = vmul.f32 %v3123_v30, %v3857_v51 }
 0x4f2   :  { %v3125_v43 = vpop.eup %3124  ;;  %3144 = vpow2.f32 %v2424_v26  ;;  %v1647_v41 = vpack.c.bf16 %v1633_v18, %v1632_v45 }
 0x4f3   :  { %v3127_v25 = vpop.eup %3126  ;;  %v1592_v47 = vadd.f32 1.0, %v3125_v43  ;;  %3146 = vpow2.f32 %v2422_v52  ;;  %v1646_v48 = vpack.c.bf16 %v1631_v33, %v1630_v63 }
 0x4f4   :  { %v3129_v35 = vpop.eup %3128  ;;  %v1590_v5 = vadd.f32 1.0, %v3127_v25  ;;  %v1918_v25 = vlaneseq }
 0x4f5   :  { %v3131_v8 = vpop.eup %3130  ;;  %3148 = vrcp.f32 %v1592_v47  ;;  %v1593_v38 = vadd.f32 1.0, %v3129_v35  ;;  %2786 = vmatprep.mubr.bf16.mxu0 %v1646_v48 }
 0x4f6   :  { %v3133_v49 = vpop.eup %3132  ;;  %3150 = vrcp.f32 %v1590_v5  ;;  %v1591_v55 = vadd.f32 1.0, %v3131_v8  ;;  %2787 = vmatmul.mubr.bf16.vlgmr.msra.gmra.mrb[48].mxu0 %v1647_v41  ;;  %v1919_v41 = vand.u32 127, %v1918_v25 }
 0x4f7   :  { %v3135_v9 = vpop.eup %3134  ;;  %v1636_v46 = vmul.f32 %v3133_v49, %v3862_v42  ;;  %3152 = vrcp.f32 %v1593_v38  ;;  %v3168_v38 = vld [vmem:[%s3935_s0] sm:$0xff] }
 0x4f8   :  { %v3137_v51 = vpop.eup %3136  ;;  %v1634_v57 = vmul.f32 %v3135_v9, %v3865_v31  ;;  %3154 = vrcp.f32 %v1591_v55  ;;  %vm1920_vm0 = vcmp.lt.s32.totalorder %v1919_v41, 64 }
 0x4f9   :  { %v3139_v13 = vpop.eup %3138  ;;  %v1637_v16 = vmul.f32 %v3137_v51, %v3869_v44 }
 0x4fa   :  { %v3141_v17 = vpop.eup %3140  ;;  %v1635_v54 = vmul.f32 %v3139_v13, %v3873_v3 }
 0x4fb   :  { %v3143_v1 = vpop.eup %3142  ;;  %v1596_v39 = vadd.f32 1.0, %v3141_v17  ;;  %v1649_v20 = vpack.c.bf16 %v1637_v16, %v1636_v46  ;;  %v2114_v46 = vpop.xlane.xlu0 %2113 }
 0x4fc   :  { %v3145_v59 = vpop.eup %3144  ;;  %v1594_v53 = vadd.f32 1.0, %v3143_v1  ;;  %v1648_v21 = vpack.c.bf16 %v1635_v54, %v1634_v57  ;;  %v2145_v51 = vadd.f32 8.0, %v2114_v46 }
 0x4fd   :  { %v3147_v22 = vpop.eup %3146  ;;  %3156 = vrcp.f32 %v1596_v39  ;;  %v1597_v42 = vadd.f32 1.0, %v3145_v59 }
 0x4fe   :  { %3158 = vrcp.f32 %v1594_v53  ;;  %v1595_v24 = vadd.f32 1.0, %v3147_v22  ;;  %2790 = vmatprep.mubr.bf16.mxu0 %v1648_v21  ;;  %v2161_v13 = vmul.f32 0.5, %v2145_v51 }
 0x4ff   :  { %v3149_v31 = vpop.eup %3148  ;;  %3160 = vrcp.f32 %v1597_v42  ;;  %2791 = vmatmul.mubr.bf16.gmra.mrb[52].mxu0 %v1649_v20 }
 0x500   :  { %v3151_v28 = vpop.eup %3150  ;;  %v1640_v44 = vmul.f32 %v3149_v31, %v3878_v19  ;;  %3162 = vrcp.f32 %v1595_v24 }
 0x501   :  { %v3153_v3 = vpop.eup %3152  ;;  %v1638_v29 = vmul.f32 %v3151_v28, %v3881_v60 }
 0x502   :  { %v3155_v32 = vpop.eup %3154  ;;  %v1641_v7 = vmul.f32 %v3153_v3, %v3885_v0 }
 0x503   :  { %v1639_v34 = vmul.f32 %v3155_v32, %v3889_v2  ;;  %v2425_v2 = vld [vmem:[%s3949_s15] ss:$0 sm:$0xff] }
 0x504   :  { %v1651_v62 = vpack.c.bf16 %v1641_v7, %v1640_v44 }
 0x505   :  { %v1650_v12 = vpack.c.bf16 %v1639_v34, %v1638_v29 }
 0x507   :  { %v3157_v56 = vpop.eup %3156  ;;  %2794 = vmatprep.mubr.bf16.mxu1 %v1650_v12 }
 0x508   :  { %v3159_v11 = vpop.eup %3158  ;;  %v1644_v40 = vmul.f32 %v3157_v56, %v3894_v50  ;;  %2795 = vmatmul.mubr.bf16.vlgmr.msra.gmra.mrb[48].mxu1 %v1651_v62 }
 0x509   :  { %v3161_v58 = vpop.eup %3160  ;;  %v1642_v19 = vmul.f32 %v3159_v11, %v3897_v61 }
 0x50a   :  { %v3163_v4 = vpop.eup %3162  ;;  %v1645_v6 = vmul.f32 %v3161_v58, %v3901_v14 }
 0x50b   :  { %v1643_v60 = vmul.f32 %v3163_v4, %v3905_v37 }
 0x50c   :  { %v1653_v10 = vpack.c.bf16 %v1645_v6, %v1644_v40 }
 0x50d   :  { %v1652_v0 = vpack.c.bf16 %v1643_v60, %v1642_v19 }
 0x50f   :  { %2798 = vmatprep.mubr.bf16.mxu1 %v1652_v0 }
 0x510   :  { %2799 = vmatmul.mubr.bf16.gmra.mrb[52].mxu1 %v1653_v10 }
 0x5c9   :  { %v2788_v36 = vpop.f32.mrb[48].mxu0 }
 0x5ca   :  { %v1759_v15 = vpop.f32.mrb[49].mxu0 }
 0x5cb   :  { %v1760_v50 = vadd.f32 %v2425_v2, %v1759_v15  ;;  %v2789_v27 = vpop.f32.mrb[50].mxu0 }
 0x5cc   :  { %v1762_v23 = vpop.f32.mrb[51].mxu0 }
 0x5cd   :  { %v2434_v26 = vmul.f32 -1.442695, %v1760_v50 }
 0x5cf   :  { %3164 = vpow2.f32 %v2434_v26 }
 0x5d2   :  { %v2792_v61 = vpop.f32.mrb[52].mxu0 }
 0x5d3   :  { %v1775_v30 = vpop.f32.mrb[53].mxu0 }
 0x5d4   :  { %v2793_v14 = vpop.f32.mrb[54].mxu0 }
 0x5d5   :  { %v1778_v45 = vpop.f32.mrb[55].mxu0 }
 0x5d9   :  { %v3165_v37 = vpop.eup %3164 }
 0x5da   :  { %v1870_v18 = vadd.f32 1.0, %v3165_v37 }
 0x5db   :  { %v2796_v52 = vpop.f32.mrb[48].mxu1 }
 0x5dc   :  { %v1791_v43 = vpop.f32.mrb[49].mxu1  ;;  %3166 = vrcp.f32 %v1870_v18 }
 0x5dd   :  { %v2797_v63 = vpop.f32.mrb[50].mxu1 }
 0x5de   :  { %v1794_v33 = vpop.f32.mrb[51].mxu1 }
 0x5e3   :  { %v2800_v47 = vpop.f32.mrb[52].mxu1 }
 0x5e4   :  { %v1807_v35 = vpop.f32.mrb[53].mxu1 }
 0x5e5   :  { %v2801_v48 = vpop.f32.mrb[54].mxu1 }
 0x5e6   :  { %v1810_v5 = vpop.f32.mrb[55].mxu1  ;;  %v3167_v8 = vpop.eup %3166 }
 0x5e7   :  { %v1921_v49 = vsub.f32 %v3168_v38, %v3167_v8 }
 0x5e9   :  { %v1937_v55 = vsel %vm1920_vm0, %v1921_v49, 0.0 }
 0x5ea   :  { %v1953_v9 = vmul.f32 %v1937_v55, %v1937_v55 }
 0x5ec   :  { %1969 = vadd.xlane.f32.xlu0 %v1953_v9 }
 0x679   :  { %v1970_v57 = vpop.xlane.xlu0 %1969 }
 0x67a   :  { %v2001_v16 = vmul.f32 -0.5, %v1970_v57 }
 0x67c   :  { %v2177_v17 = vsub.f32 %v2001_v16, %v2161_v13 }
 0x67e   :  { %v2261_v54 = vsel %vm2260_vm1, %v2177_v17, 0.0 }
 0x67f   :  { %2292 = vadd.xlane.f32.xlu1 %v2261_v54 }
 0x70c   :  { %v2293_v1 = vpop.xlane.xlu1 %2292 }
 0x70d   :  { %v2294_v39 = vrot.slane %v2293_v1, 4 }
 0x70f   :  { %v2295_v20 = vadd.f32 %v2294_v39, %v2293_v1 }
 0x711   :  { %v2296_v59 = vrot.slane %v2295_v20, 2 }
 0x713   :  { %v2297_v53 = vadd.f32 %v2296_v59, %v2295_v20 }
 0x715   :  { %v2298_v21 = vrot.slane %v2297_v53, 1 }
 0x717   :  { %v2299_v22 = vadd.f32 %v2298_v21, %v2297_v53 }
 0x719   :  { %2818 = vpush %v2299_v22 }
 0x74a   :  { %s2819_s0 = spop %2818 }
 0x74b   :  { %v2301_v42 = vstv %s2819_s0 }
 0x74c   :  { %2302 = vst [vmem:[%s3950_s16] sm:$0xff] %v2301_v42 }

</bundles_post_ra>
